<compile_context>
chip_gen: v7x
topology: tpu7x:2x2x1
jax: 0.10.0
libtpu: 0.0.40
codegen_flags: <defaults>
</compile_context>

<pallas_src>
import math

import jax
import jax.numpy as jnp
from jax.experimental import pallas as pl
from jax.experimental.pallas import tpu as pltpu

BN_EPS = 1e-5


# ---------------------------------------------------------------------------
# Fused BasicUnit kernel (one batch image per grid step, NHWC layout)
# ---------------------------------------------------------------------------
def _basic_unit_kernel(x_ref, w1_ref, s1_ref, b1_ref, wd_ref, sd_ref, bd_ref,
                       w2_ref, s2_ref, b2_ref, o_ref):
    x = x_ref[...]                                   # (1, H, W, C) fp32
    _, h, w, c = x.shape
    ch = c // 2

    # ---- right branch, 1x1 conv + BN + ReLU (bf16 MXU dot, f32 accumulate) --
    xr = x[..., ch:].reshape(h * w, ch).astype(jnp.bfloat16)
    y = jnp.dot(xr, w1_ref[...], preferred_element_type=jnp.float32)
    y = jnp.maximum(y * s1_ref[...] + b1_ref[...], 0.0)
    y = y.reshape(1, h, w, ch)

    # ---- depthwise 3x3, padding=1, + BN (no ReLU) ---------------------------
    # In-kernel zero padding: H pad is along a leading (untiled) dim; W pad
    # uses 8-wide zero blocks so the sublane-dim concat stays tile aligned.
    zrow = jnp.zeros((1, 1, w, ch), jnp.float32)
    yp = jnp.concatenate([zrow, y, zrow], axis=1)            # (1, H+2, W,    ch)
    zcol = jnp.zeros((1, h + 2, 8, ch), jnp.float32)
    yp = jnp.concatenate([zcol, yp, zcol], axis=2)           # (1, H+2, W+16, ch)

    wd = wd_ref[...]                                         # (9, ch) fp32
    acc = jnp.zeros((1, h, w, ch), jnp.float32)
    for kh in range(3):
        for kw in range(3):
            tap = wd[kh * 3 + kw, :].reshape(1, 1, 1, ch)
            # logical pad of 1 lives at column offset 7 of the 8-wide pad
            acc = acc + yp[:, kh:kh + h, 7 + kw:7 + kw + w, :] * tap
    y = acc * sd_ref[...].reshape(1, 1, 1, ch) + bd_ref[...].reshape(1, 1, 1, ch)

    # ---- 1x1 conv + BN + ReLU ----------------------------------------------
    y = jnp.dot(y.reshape(h * w, ch).astype(jnp.bfloat16), w2_ref[...],
                preferred_element_type=jnp.float32)
    y = jnp.maximum(y * s2_ref[...] + b2_ref[...], 0.0)

    # ---- store [left | right]; channel shuffle is folded into the wrapper's
    #      single NHWC -> NCHW boundary transpose ------------------------------
    o_ref[:, :, :, :ch] = x[..., :ch]
    o_ref[:, :, :, ch:] = y.reshape(1, h, w, ch)


# ---------------------------------------------------------------------------
# Wrapper: NCHW in / NCHW out, single pallas_call
# ---------------------------------------------------------------------------
def basic_unit_forward(params, x_nchw):
    n, c, h, w = x_nchw.shape
    assert c % 2 == 0
    ch = c // 2

    x = jnp.transpose(x_nchw, (0, 2, 3, 1))          # NCHW -> NHWC (once)

    y = pl.pallas_call(
        _basic_unit_kernel,
        out_shape=jax.ShapeDtypeStruct((n, h, w, c), jnp.float32),
        grid=(n,),
        in_specs=[
            pl.BlockSpec((1, h, w, c), lambda b: (b, 0, 0, 0)),   # x
            pl.BlockSpec((ch, ch), lambda b: (0, 0)),             # w1 (bf16)
            pl.BlockSpec((1, ch), lambda b: (0, 0)),              # s1
            pl.BlockSpec((1, ch), lambda b: (0, 0)),              # b1
            pl.BlockSpec((9, ch), lambda b: (0, 0)),              # wd
            pl.BlockSpec((1, ch), lambda b: (0, 0)),              # sd
            pl.BlockSpec((1, ch), lambda b: (0, 0)),              # bd
            pl.BlockSpec((ch, ch), lambda b: (0, 0)),             # w2 (bf16)
            pl.BlockSpec((1, ch), lambda b: (0, 0)),              # s2
            pl.BlockSpec((1, ch), lambda b: (0, 0)),              # b2
        ],
        out_specs=pl.BlockSpec((1, h, w, c), lambda b: (b, 0, 0, 0)),
        compiler_params=pltpu.CompilerParams(
            dimension_semantics=("parallel",)),                   # 2 TCs on v7x
    )(x, params["w1"], params["s1"], params["b1"],
      params["wd"], params["sd"], params["bd"],
      params["w2"], params["s2"], params["b2"])

    # Kernel output channels are in concat order [left | right].  The channel
    # shuffle (groups=2): out[2i+g] = half_g[i], is folded into the single
    # NHWC -> NCHW boundary transpose below (no extra elementwise pass).
    return y.reshape(n, h, w, 2, ch).transpose(0, 4, 3, 1, 2).reshape(n, c, h, w)


# ---------------------------------------------------------------------------
# Pure-JAX NCHW reference (mirrors the PyTorch BasicUnit forward)
# ---------------------------------------------------------------------------
def basic_unit_reference(params, x_nchw):
    n, c, h, w = x_nchw.shape
    ch = c // 2
    w1 = params["w1"].astype(jnp.float32)
    w2 = params["w2"].astype(jnp.float32)

    def bn(y, s, b):
        return y * s.reshape(1, ch, 1, 1) + b.reshape(1, ch, 1, 1)

    x_left, x_right = x_nchw[:, :ch], x_nchw[:, ch:]

    y = jnp.einsum("nihw,io->nohw", x_right, w1)
    y = jnp.maximum(bn(y, params["s1"], params["b1"]), 0.0)

    yp = jnp.pad(y, ((0, 0), (0, 0), (1, 1), (1, 1)))
    acc = jnp.zeros_like(y)
    for kh in range(3):
        for kw in range(3):
            tap = params["wd"][kh * 3 + kw].reshape(1, ch, 1, 1)
            acc = acc + yp[:, :, kh:kh + h, kw:kw + w] * tap
    y = bn(acc, params["sd"], params["bd"])

    y = jnp.einsum("nihw,io->nohw", y, w2)
    y = jnp.maximum(bn(y, params["s2"], params["b2"]), 0.0)

    cat = jnp.concatenate([x_left, y], axis=1)
    # channel_shuffle with num_groups=2
    return cat.reshape(n, 2, ch, h, w).transpose(0, 2, 1, 3, 4).reshape(n, c, h, w)


# ---------------------------------------------------------------------------
# Deterministic parameter init (xavier_normal for convs, eval-mode BN folded)
# ---------------------------------------------------------------------------
def init_params(key, in_channels):
    ch = in_channels // 2
    k1, k2, k3 = jax.random.split(key, 3)

    def xavier_normal(k, shape_pt):                  # PyTorch (out, in/groups, kh, kw)
        out_c, in_c, kh, kw = shape_pt
        std = math.sqrt(2.0 / (in_c * kh * kw + out_c * kh * kw))
        return std * jax.random.normal(k, shape_pt, jnp.float32)

    bn_scale = jnp.full((1, ch), 1.0 / math.sqrt(1.0 + BN_EPS), jnp.float32)
    bn_bias = jnp.zeros((1, ch), jnp.float32)

    w1_pt = xavier_normal(k1, (ch, ch, 1, 1))
    wd_pt = xavier_normal(k2, (ch, 1, 3, 3))         # depthwise, groups=ch
    w2_pt = xavier_normal(k3, (ch, ch, 1, 1))

    return {
        "w1": jnp.transpose(w1_pt[:, :, 0, 0]).astype(jnp.bfloat16),   # (cin, cout)
        "s1": bn_scale, "b1": bn_bias,
        "wd": jnp.transpose(wd_pt[:, 0].reshape(ch, 9)),               # (9, ch) fp32
        "sd": bn_scale, "bd": bn_bias,
        "w2": jnp.transpose(w2_pt[:, :, 0, 0]).astype(jnp.bfloat16),
        "s2": bn_scale, "b2": bn_bias,
    }


# ---------------------------------------------------------------------------
if __name__ == "__main__":
    key = jax.random.PRNGKey(0)
    k_params, k_x = jax.random.split(key)

    N, C, H, W = 2, 16, 16, 16                       # BasicUnit(in_channels=16)
    params = init_params(k_params, C)
    x = jax.random.normal(k_x, (N, C, H, W), jnp.float32)

    fwd = jax.jit(basic_unit_forward)
    out = fwd(params, x)
    jax.block_until_ready(out)

    assert out.shape == (N, C, H, W)
    assert out.dtype == jnp.float32

    # Self-check against the pure-JAX reference (loose tolerance because the
    # kernel uses bf16 MXU operands with f32 accumulation).
    ref = basic_unit_reference(params, x)
    max_err = float(jnp.max(jnp.abs(out - ref)))
    assert jnp.allclose(out, ref, rtol=1e-1, atol=1e-1), max_err

    print("KERNEL_OK")
</pallas_src>

<mosaic_0001>
module attributes {stable_mosaic.version = 11 : i64} {
  func.func @_basic_unit_kernel(%arg0: i32, %arg1: memref<1x16x16x16xf32, #tpu.memory_space<vmem>>, %arg2: memref<8x8xbf16, #tpu.memory_space<vmem>>, %arg3: memref<1x8xf32, #tpu.memory_space<vmem>>, %arg4: memref<1x8xf32, #tpu.memory_space<vmem>>, %arg5: memref<9x8xf32, #tpu.memory_space<vmem>>, %arg6: memref<1x8xf32, #tpu.memory_space<vmem>>, %arg7: memref<1x8xf32, #tpu.memory_space<vmem>>, %arg8: memref<8x8xbf16, #tpu.memory_space<vmem>>, %arg9: memref<1x8xf32, #tpu.memory_space<vmem>>, %arg10: memref<1x8xf32, #tpu.memory_space<vmem>>, %arg11: memref<1x16x16x16xf32, #tpu.memory_space<vmem>>) attributes {dimension_semantics = [#tpu.dimension_semantics<parallel>], iteration_bounds = array<i64: 2>, scalar_prefetch = 0 : i64, scratch_operands = 0 : i64, tpu.core_type = #tpu.core_type<tc>, window_params = [{transform_indices = @transform_0, window_bounds = array<i64: 1, 16, 16, 16>}, {pipeline_mode = #tpu.pipeline_mode<synchronous>, transform_indices = @transform_1, window_bounds = array<i64: 8, 8>}, {pipeline_mode = #tpu.pipeline_mode<synchronous>, transform_indices = @transform_2, window_bounds = array<i64: 1, 8>}, {pipeline_mode = #tpu.pipeline_mode<synchronous>, transform_indices = @transform_3, window_bounds = array<i64: 1, 8>}, {pipeline_mode = #tpu.pipeline_mode<synchronous>, transform_indices = @transform_4, window_bounds = array<i64: 9, 8>}, {pipeline_mode = #tpu.pipeline_mode<synchronous>, transform_indices = @transform_5, window_bounds = array<i64: 1, 8>}, {pipeline_mode = #tpu.pipeline_mode<synchronous>, transform_indices = @transform_6, window_bounds = array<i64: 1, 8>}, {pipeline_mode = #tpu.pipeline_mode<synchronous>, transform_indices = @transform_7, window_bounds = array<i64: 8, 8>}, {pipeline_mode = #tpu.pipeline_mode<synchronous>, transform_indices = @transform_8, window_bounds = array<i64: 1, 8>}, {pipeline_mode = #tpu.pipeline_mode<synchronous>, transform_indices = @transform_9, window_bounds = array<i64: 1, 8>}, {transform_indices = @transform_10, window_bounds = array<i64: 1, 16, 16, 16>}]} {
    %c0 = arith.constant 0 : index
    %c0_0 = arith.constant 0 : index
    %c0_1 = arith.constant 0 : index
    %c0_2 = arith.constant 0 : index
    %0 = vector.load %arg1[%c0, %c0_0, %c0_1, %c0_2] : memref<1x16x16x16xf32, #tpu.memory_space<vmem>>, vector<1x16x16x16xf32>
    %1 = vector.extract_strided_slice %0 {offsets = [0, 0, 0, 8], sizes = [1, 16, 16, 8], strides = [1, 1, 1, 1]} : vector<1x16x16x16xf32> to vector<1x16x16x8xf32>
    %2 = vector.shape_cast %1 : vector<1x16x16x8xf32> to vector<256x8xf32>
    %3 = arith.truncf %2 : vector<256x8xf32> to vector<256x8xbf16>
    %c0_3 = arith.constant 0 : index
    %c0_4 = arith.constant 0 : index
    %4 = vector.load %arg2[%c0_3, %c0_4] : memref<8x8xbf16, #tpu.memory_space<vmem>>, vector<8x8xbf16>
    %cst = arith.constant dense<0.000000e+00> : vector<256x8xf32>
    %5 = tpu.matmul %3, %4, %cst {dimension_numbers = #tpu.dot_dimension_numbers<[1], [0], [0], [1], [0, 0, 1, 1], [], []>} : vector<256x8xbf16>, vector<8x8xbf16>, vector<256x8xf32> -> vector<256x8xf32>
    %c0_5 = arith.constant 0 : index
    %c0_6 = arith.constant 0 : index
    %6 = vector.load %arg3[%c0_5, %c0_6] : memref<1x8xf32, #tpu.memory_space<vmem>>, vector<1x8xf32>
    %7 = vector.broadcast %6 : vector<1x8xf32> to vector<256x8xf32>
    %8 = arith.mulf %5, %7 : vector<256x8xf32>
    %c0_7 = arith.constant 0 : index
    %c0_8 = arith.constant 0 : index
    %9 = vector.load %arg4[%c0_7, %c0_8] : memref<1x8xf32, #tpu.memory_space<vmem>>, vector<1x8xf32>
    %10 = vector.broadcast %9 : vector<1x8xf32> to vector<256x8xf32>
    %11 = arith.addf %8, %10 : vector<256x8xf32>
    %cst_9 = arith.constant 0.000000e+00 : f32
    %12 = vector.broadcast %cst_9 : f32 to vector<256x8xf32>
    %13 = arith.maximumf %11, %12 : vector<256x8xf32>
    %14 = vector.shape_cast %13 : vector<256x8xf32> to vector<1x16x16x8xf32>
    %cst_10 = arith.constant 0.000000e+00 : f32
    %15 = vector.broadcast %cst_10 : f32 to vector<1x1x16x8xf32>
    %16 = tpu.concatenate %15, %14, %15 in 1 : vector<1x1x16x8xf32>, vector<1x16x16x8xf32>, vector<1x1x16x8xf32> -> vector<1x18x16x8xf32>
    %cst_11 = arith.constant 0.000000e+00 : f32
    %17 = vector.broadcast %cst_11 : f32 to vector<1x18x8x8xf32>
    %18 = tpu.concatenate %17, %16, %17 in 2 : vector<1x18x8x8xf32>, vector<1x18x16x8xf32>, vector<1x18x8x8xf32> -> vector<1x18x32x8xf32>
    %c0_12 = arith.constant 0 : index
    %c0_13 = arith.constant 0 : index
    %19 = vector.load %arg5[%c0_12, %c0_13] : memref<9x8xf32, #tpu.memory_space<vmem>>, vector<9x8xf32>
    %cst_14 = arith.constant 0.000000e+00 : f32
    %20 = vector.broadcast %cst_14 : f32 to vector<1x16x16x8xf32>
    %21 = vector.extract_strided_slice %19 {offsets = [0, 0], sizes = [1, 8], strides = [1, 1]} : vector<9x8xf32> to vector<1x8xf32>
    %22 = vector.shape_cast %21 : vector<1x8xf32> to vector<8xf32>
    %23 = vector.shape_cast %22 : vector<8xf32> to vector<1x1x1x8xf32>
    %24 = vector.extract_strided_slice %18 {offsets = [0, 0, 7, 0], sizes = [1, 16, 16, 8], strides = [1, 1, 1, 1]} : vector<1x18x32x8xf32> to vector<1x16x16x8xf32>
    %25 = vector.broadcast %23 : vector<1x1x1x8xf32> to vector<1x16x16x8xf32>
    %26 = arith.mulf %24, %25 : vector<1x16x16x8xf32>
    %27 = arith.addf %20, %26 : vector<1x16x16x8xf32>
    %28 = vector.extract_strided_slice %19 {offsets = [1, 0], sizes = [1, 8], strides = [1, 1]} : vector<9x8xf32> to vector<1x8xf32>
    %29 = vector.shape_cast %28 : vector<1x8xf32> to vector<8xf32>
    %30 = vector.shape_cast %29 : vector<8xf32> to vector<1x1x1x8xf32>
    %31 = vector.extract_strided_slice %18 {offsets = [0, 0, 8, 0], sizes = [1, 16, 16, 8], strides = [1, 1, 1, 1]} : vector<1x18x32x8xf32> to vector<1x16x16x8xf32>
    %32 = vector.broadcast %30 : vector<1x1x1x8xf32> to vector<1x16x16x8xf32>
    %33 = arith.mulf %31, %32 : vector<1x16x16x8xf32>
    %34 = arith.addf %27, %33 : vector<1x16x16x8xf32>
    %35 = vector.extract_strided_slice %19 {offsets = [2, 0], sizes = [1, 8], strides = [1, 1]} : vector<9x8xf32> to vector<1x8xf32>
    %36 = vector.shape_cast %35 : vector<1x8xf32> to vector<8xf32>
    %37 = vector.shape_cast %36 : vector<8xf32> to vector<1x1x1x8xf32>
    %38 = vector.extract_strided_slice %18 {offsets = [0, 0, 9, 0], sizes = [1, 16, 16, 8], strides = [1, 1, 1, 1]} : vector<1x18x32x8xf32> to vector<1x16x16x8xf32>
    %39 = vector.broadcast %37 : vector<1x1x1x8xf32> to vector<1x16x16x8xf32>
    %40 = arith.mulf %38, %39 : vector<1x16x16x8xf32>
    %41 = arith.addf %34, %40 : vector<1x16x16x8xf32>
    %42 = vector.extract_strided_slice %19 {offsets = [3, 0], sizes = [1, 8], strides = [1, 1]} : vector<9x8xf32> to vector<1x8xf32>
    %43 = vector.shape_cast %42 : vector<1x8xf32> to vector<8xf32>
    %44 = vector.shape_cast %43 : vector<8xf32> to vector<1x1x1x8xf32>
    %45 = vector.extract_strided_slice %18 {offsets = [0, 1, 7, 0], sizes = [1, 16, 16, 8], strides = [1, 1, 1, 1]} : vector<1x18x32x8xf32> to vector<1x16x16x8xf32>
    %46 = vector.broadcast %44 : vector<1x1x1x8xf32> to vector<1x16x16x8xf32>
    %47 = arith.mulf %45, %46 : vector<1x16x16x8xf32>
    %48 = arith.addf %41, %47 : vector<1x16x16x8xf32>
    %49 = vector.extract_strided_slice %19 {offsets = [4, 0], sizes = [1, 8], strides = [1, 1]} : vector<9x8xf32> to vector<1x8xf32>
    %50 = vector.shape_cast %49 : vector<1x8xf32> to vector<8xf32>
    %51 = vector.shape_cast %50 : vector<8xf32> to vector<1x1x1x8xf32>
    %52 = vector.extract_strided_slice %18 {offsets = [0, 1, 8, 0], sizes = [1, 16, 16, 8], strides = [1, 1, 1, 1]} : vector<1x18x32x8xf32> to vector<1x16x16x8xf32>
    %53 = vector.broadcast %51 : vector<1x1x1x8xf32> to vector<1x16x16x8xf32>
    %54 = arith.mulf %52, %53 : vector<1x16x16x8xf32>
    %55 = arith.addf %48, %54 : vector<1x16x16x8xf32>
    %56 = vector.extract_strided_slice %19 {offsets = [5, 0], sizes = [1, 8], strides = [1, 1]} : vector<9x8xf32> to vector<1x8xf32>
    %57 = vector.shape_cast %56 : vector<1x8xf32> to vector<8xf32>
    %58 = vector.shape_cast %57 : vector<8xf32> to vector<1x1x1x8xf32>
    %59 = vector.extract_strided_slice %18 {offsets = [0, 1, 9, 0], sizes = [1, 16, 16, 8], strides = [1, 1, 1, 1]} : vector<1x18x32x8xf32> to vector<1x16x16x8xf32>
    %60 = vector.broadcast %58 : vector<1x1x1x8xf32> to vector<1x16x16x8xf32>
    %61 = arith.mulf %59, %60 : vector<1x16x16x8xf32>
    %62 = arith.addf %55, %61 : vector<1x16x16x8xf32>
    %63 = vector.extract_strided_slice %19 {offsets = [6, 0], sizes = [1, 8], strides = [1, 1]} : vector<9x8xf32> to vector<1x8xf32>
    %64 = vector.shape_cast %63 : vector<1x8xf32> to vector<8xf32>
    %65 = vector.shape_cast %64 : vector<8xf32> to vector<1x1x1x8xf32>
    %66 = vector.extract_strided_slice %18 {offsets = [0, 2, 7, 0], sizes = [1, 16, 16, 8], strides = [1, 1, 1, 1]} : vector<1x18x32x8xf32> to vector<1x16x16x8xf32>
    %67 = vector.broadcast %65 : vector<1x1x1x8xf32> to vector<1x16x16x8xf32>
    %68 = arith.mulf %66, %67 : vector<1x16x16x8xf32>
    %69 = arith.addf %62, %68 : vector<1x16x16x8xf32>
    %70 = vector.extract_strided_slice %19 {offsets = [7, 0], sizes = [1, 8], strides = [1, 1]} : vector<9x8xf32> to vector<1x8xf32>
    %71 = vector.shape_cast %70 : vector<1x8xf32> to vector<8xf32>
    %72 = vector.shape_cast %71 : vector<8xf32> to vector<1x1x1x8xf32>
    %73 = vector.extract_strided_slice %18 {offsets = [0, 2, 8, 0], sizes = [1, 16, 16, 8], strides = [1, 1, 1, 1]} : vector<1x18x32x8xf32> to vector<1x16x16x8xf32>
    %74 = vector.broadcast %72 : vector<1x1x1x8xf32> to vector<1x16x16x8xf32>
    %75 = arith.mulf %73, %74 : vector<1x16x16x8xf32>
    %76 = arith.addf %69, %75 : vector<1x16x16x8xf32>
    %77 = vector.extract_strided_slice %19 {offsets = [8, 0], sizes = [1, 8], strides = [1, 1]} : vector<9x8xf32> to vector<1x8xf32>
    %78 = vector.shape_cast %77 : vector<1x8xf32> to vector<8xf32>
    %79 = vector.shape_cast %78 : vector<8xf32> to vector<1x1x1x8xf32>
    %80 = vector.extract_strided_slice %18 {offsets = [0, 2, 9, 0], sizes = [1, 16, 16, 8], strides = [1, 1, 1, 1]} : vector<1x18x32x8xf32> to vector<1x16x16x8xf32>
    %81 = vector.broadcast %79 : vector<1x1x1x8xf32> to vector<1x16x16x8xf32>
    %82 = arith.mulf %80, %81 : vector<1x16x16x8xf32>
    %83 = arith.addf %76, %82 : vector<1x16x16x8xf32>
    %c0_15 = arith.constant 0 : index
    %c0_16 = arith.constant 0 : index
    %84 = vector.load %arg6[%c0_15, %c0_16] : memref<1x8xf32, #tpu.memory_space<vmem>>, vector<1x8xf32>
    %85 = vector.shape_cast %84 : vector<1x8xf32> to vector<1x1x1x8xf32>
    %86 = vector.broadcast %85 : vector<1x1x1x8xf32> to vector<1x16x16x8xf32>
    %87 = arith.mulf %83, %86 : vector<1x16x16x8xf32>
    %c0_17 = arith.constant 0 : index
    %c0_18 = arith.constant 0 : index
    %88 = vector.load %arg7[%c0_17, %c0_18] : memref<1x8xf32, #tpu.memory_space<vmem>>, vector<1x8xf32>
    %89 = vector.shape_cast %88 : vector<1x8xf32> to vector<1x1x1x8xf32>
    %90 = vector.broadcast %89 : vector<1x1x1x8xf32> to vector<1x16x16x8xf32>
    %91 = arith.addf %87, %90 : vector<1x16x16x8xf32>
    %92 = vector.shape_cast %91 : vector<1x16x16x8xf32> to vector<256x8xf32>
    %93 = arith.truncf %92 : vector<256x8xf32> to vector<256x8xbf16>
    %c0_19 = arith.constant 0 : index
    %c0_20 = arith.constant 0 : index
    %94 = vector.load %arg8[%c0_19, %c0_20] : memref<8x8xbf16, #tpu.memory_space<vmem>>, vector<8x8xbf16>
    %cst_21 = arith.constant dense<0.000000e+00> : vector<256x8xf32>
    %95 = tpu.matmul %93, %94, %cst_21 {dimension_numbers = #tpu.dot_dimension_numbers<[1], [0], [0], [1], [0, 0, 1, 1], [], []>} : vector<256x8xbf16>, vector<8x8xbf16>, vector<256x8xf32> -> vector<256x8xf32>
    %c0_22 = arith.constant 0 : index
    %c0_23 = arith.constant 0 : index
    %96 = vector.load %arg9[%c0_22, %c0_23] : memref<1x8xf32, #tpu.memory_space<vmem>>, vector<1x8xf32>
    %97 = vector.broadcast %96 : vector<1x8xf32> to vector<256x8xf32>
    %98 = arith.mulf %95, %97 : vector<256x8xf32>
    %c0_24 = arith.constant 0 : index
    %c0_25 = arith.constant 0 : index
    %99 = vector.load %arg10[%c0_24, %c0_25] : memref<1x8xf32, #tpu.memory_space<vmem>>, vector<1x8xf32>
    %100 = vector.broadcast %99 : vector<1x8xf32> to vector<256x8xf32>
    %101 = arith.addf %98, %100 : vector<256x8xf32>
    %cst_26 = arith.constant 0.000000e+00 : f32
    %102 = vector.broadcast %cst_26 : f32 to vector<256x8xf32>
    %103 = arith.maximumf %101, %102 : vector<256x8xf32>
    %104 = vector.extract_strided_slice %0 {offsets = [0, 0, 0, 0], sizes = [1, 16, 16, 8], strides = [1, 1, 1, 1]} : vector<1x16x16x16xf32> to vector<1x16x16x8xf32>
    %c0_27 = arith.constant 0 : index
    %c0_28 = arith.constant 0 : index
    %c0_29 = arith.constant 0 : index
    %c0_30 = arith.constant 0 : index
    %105 = vector.load %arg11[%c0_27, %c0_28, %c0_29, %c0_30] : memref<1x16x16x16xf32, #tpu.memory_space<vmem>>, vector<1x16x16x8xf32>
    tpu.vector_store %arg11[%c0_27, %c0_28, %c0_29, %c0_30], %104 {strides = array<i32>} : memref<1x16x16x16xf32, #tpu.memory_space<vmem>>, vector<1x16x16x8xf32>,
    %106 = vector.shape_cast %103 : vector<256x8xf32> to vector<1x16x16x8xf32>
    %c0_31 = arith.constant 0 : index
    %c0_32 = arith.constant 0 : index
    %c0_33 = arith.constant 0 : index
    %c8 = arith.constant 8 : index
    %107 = vector.load %arg11[%c0_31, %c0_32, %c0_33, %c8] : memref<1x16x16x16xf32, #tpu.memory_space<vmem>>, vector<1x16x16x8xf32>
    tpu.vector_store %arg11[%c0_31, %c0_32, %c0_33, %c8], %106 {strides = array<i32>} : memref<1x16x16x16xf32, #tpu.memory_space<vmem>>, vector<1x16x16x8xf32>,
    return
  }
  func.func @transform_0(%arg0: i32) -> (i32, i32, i32, i32) {
    %c0_i32 = arith.constant 0 : i32
    %c0_i32_0 = arith.constant 0 : i32
    %c0_i32_1 = arith.constant 0 : i32
    %c0_i32_2 = arith.constant 0 : i32
    return %arg0, %c0_i32, %c0_i32_0, %c0_i32_1 : i32, i32, i32, i32
  }
  func.func @transform_1(%arg0: i32) -> (i32, i32) {
    %c0_i32 = arith.constant 0 : i32
    %c0_i32_0 = arith.constant 0 : i32
    %c0_i32_1 = arith.constant 0 : i32
    return %c0_i32, %c0_i32_0 : i32, i32
  }
  func.func @transform_2(%arg0: i32) -> (i32, i32) {
    %c0_i32 = arith.constant 0 : i32
    %c0_i32_0 = arith.constant 0 : i32
    %c0_i32_1 = arith.constant 0 : i32
    return %c0_i32, %c0_i32_0 : i32, i32
  }
  func.func @transform_3(%arg0: i32) -> (i32, i32) {
    %c0_i32 = arith.constant 0 : i32
    %c0_i32_0 = arith.constant 0 : i32
    %c0_i32_1 = arith.constant 0 : i32
    return %c0_i32, %c0_i32_0 : i32, i32
  }
  func.func @transform_4(%arg0: i32) -> (i32, i32) {
    %c0_i32 = arith.constant 0 : i32
    %c0_i32_0 = arith.constant 0 : i32
    %c0_i32_1 = arith.constant 0 : i32
    return %c0_i32, %c0_i32_0 : i32, i32
  }
  func.func @transform_5(%arg0: i32) -> (i32, i32) {
    %c0_i32 = arith.constant 0 : i32
    %c0_i32_0 = arith.constant 0 : i32
    %c0_i32_1 = arith.constant 0 : i32
    return %c0_i32, %c0_i32_0 : i32, i32
  }
  func.func @transform_6(%arg0: i32) -> (i32, i32) {
    %c0_i32 = arith.constant 0 : i32
    %c0_i32_0 = arith.constant 0 : i32
    %c0_i32_1 = arith.constant 0 : i32
    return %c0_i32, %c0_i32_0 : i32, i32
  }
  func.func @transform_7(%arg0: i32) -> (i32, i32) {
    %c0_i32 = arith.constant 0 : i32
    %c0_i32_0 = arith.constant 0 : i32
    %c0_i32_1 = arith.constant 0 : i32
    return %c0_i32, %c0_i32_0 : i32, i32
  }
  func.func @transform_8(%arg0: i32) -> (i32, i32) {
    %c0_i32 = arith.constant 0 : i32
    %c0_i32_0 = arith.constant 0 : i32
    %c0_i32_1 = arith.constant 0 : i32
    return %c0_i32, %c0_i32_0 : i32, i32
  }
  func.func @transform_9(%arg0: i32) -> (i32, i32) {
    %c0_i32 = arith.constant 0 : i32
    %c0_i32_0 = arith.constant 0 : i32
    %c0_i32_1 = arith.constant 0 : i32
    return %c0_i32, %c0_i32_0 : i32, i32
  }
  func.func @transform_10(%arg0: i32) -> (i32, i32, i32, i32) {
    %c0_i32 = arith.constant 0 : i32
    %c0_i32_0 = arith.constant 0 : i32
    %c0_i32_1 = arith.constant 0 : i32
    %c0_i32_2 = arith.constant 0 : i32
    return %arg0, %c0_i32, %c0_i32_0, %c0_i32_1 : i32, i32, i32, i32
  }
}

</mosaic_0001>

<bundles_post_ra>
// kernel: basic_unit_forward.1
= control target key start
LH: loop header
LB: loop body
LE: loop exit
PB: predicated region body
PF: predicated region fallthrough
CT: control target
= control target key end

     0   :  { %s3421_s13 = smov 0   ;;  %s5024_s0 = inlined_call_operand.vmem [shape: f32[2,16,16,16], index: 0, kind: input, shape index: {}]   ;;  %s5025_s1 = inlined_call_operand.vmem [shape: bf16[8,8], index: 1, kind: input, shape index: {}]   ;;  %s5026_s2 = inlined_call_operand.vmem [shape: f32[1,8], index: 2, kind: input, shape index: {}]   ;;  %s5027_s3 = inlined_call_operand.vmem [shape: f32[1,8], index: 3, kind: input, shape index: {}]   ;;  %s5028_s4 = inlined_call_operand.vmem [shape: f32[9,8], index: 4, kind: input, shape index: {}]   ;;  %s5029_s5 = inlined_call_operand.vmem [shape: f32[1,8], index: 5, kind: input, shape index: {}]   ;;  %s5030_s6 = inlined_call_operand.vmem [shape: f32[1,8], index: 6, kind: input, shape index: {}]   ;;  %s5031_s7 = inlined_call_operand.vmem [shape: bf16[8,8], index: 7, kind: input, shape index: {}]   ;;  %s5032_s8 = inlined_call_operand.vmem [shape: f32[1,8], index: 8, kind: input, shape index: {}]   ;;  %s5033_s9 = inlined_call_operand.vmem [shape: f32[1,8], index: 9, kind: input, shape index: {}]   ;;  %s5034_s10 = inlined_call_operand.vmem [shape: f32[2,16,16,16], index: 10, kind: output, shape index: {}]  }
   0x1 LB: > { %s3182_s14 = sadd.s32 4294967295, %s3362_s13   ;;  %p3186_p0 = scmp.ge.s32.totalorder %s3362_s13, 1  ;;  %s3362_s13 = sphi %s3421_s13, %s20_s13  }
   0x2   : > { %p312_p1 = scmp.lt.s32.totalorder %s3362_s13, 3 }
   0x4   : > { %p313_p2 = pnand %p3186_p0, %p312_p1 }
   0x6   : > { %316 = sbr.rel (%p313_p2) target bundleno = 1030 (0x406), region = 60 }
   0xd   : > { %p350_p3 = scmp.lt.s32.totalorder %s3182_s14, 1  ;;  %v409_v0 = vld [vmem:[%s5025_s1] sm:$0xf]  ;;  %vm507_vm0 = vcmask 1043456   ;;  %vm458_vm1 = vcmask 64512   ;;  %s3364_s24 = smov 120  }
   0xe   : > { %3336 = vmatprep.subr.msk.bf16.mxu0 %vm507_vm0, %v409_v0  ;;  %v509_v1 = vsel %vm507_vm0, %v409_v0, 0  ;;  %vm916_vm2 = vcmask 1046528   ;;  %vm1124_vm3 = vcmask 1045504   ;;  %vm2482_vm4 = vcmask 1040384   ;;  %s3365_s22 = smov 8  }
   0xf   : > { %s5074_s14 = smov (!%p350_p3, %s3182_s14), 1  ;;  %3269 = vmatpush3.bf16.msra.mxu0 %v509_v1  ;;  %vm3094_vm5 = vcmask 130112  }
  0x10   : > { %s3232_s17 = sshll.u32 %s5074_s14, 8 }
  0x11   : > { %s3437_s20 = scalar_lea.vmem %s5024_s0, %s3232_s17  ;;  %s3442_s23 = scalar_lea.vmem %s5034_s10, %s3232_s17 }
  0x12   : > { %v361_v2 = vld [vmem:[%s3437_s20] sm:$0xff]  ;;  %v362_v3 = vld [vmem:[%s3437_s20 + $0x8] sm:$0xff]  ;;  %v363_v4 = vld [vmem:[%s3437_s20 + $0x10] sm:$0xff] }
  0x13   : > { %v393_v5 = vpack.c.bf16 %v362_v3, %v361_v2  ;;  %2934 = vst.msk [vmem:[%s3442_s23] sm:$0xff] %vm458_vm1, %v361_v2  ;;  %2935 = vst.msk [vmem:[%s3442_s23 + $0x8] sm:$0xff] %vm458_vm1, %v362_v3  ;;  %v364_v6 = vld [vmem:[%s3437_s20 + $0x18] sm:$0xff]  ;;  %v365_v7 = vld [vmem:[%s3437_s20 + $0x20] sm:$0xff] }
  0x14   : > { %2936 = vst.msk [vmem:[%s3442_s23 + $0x10] sm:$0xff] %vm458_vm1, %v363_v4  ;;  %v366_v8 = vld [vmem:[%s3437_s20 + $0x28] sm:$0xff]  ;;  %2937 = vst.msk [vmem:[%s3442_s23 + $0x18] sm:$0xff] %vm458_vm1, %v364_v6  ;;  %v367_v10 = vld [vmem:[%s3437_s20 + $0x30] sm:$0xff]  ;;  %v394_v13 = vpack.c.bf16 %v364_v6, %v363_v4  ;;  %v784_v4 = vlaneseq }
  0x15   : > { %v395_v9 = vpack.c.bf16 %v366_v8, %v365_v7  ;;  %2938 = vst.msk [vmem:[%s3442_s23 + $0x20] sm:$0xff] %vm458_vm1, %v365_v7  ;;  %2939 = vst.msk [vmem:[%s3442_s23 + $0x28] sm:$0xff] %vm458_vm1, %v366_v8  ;;  %v368_v11 = vld [vmem:[%s3437_s20 + $0x38] sm:$0xff]  ;;  %v369_v12 = vld [vmem:[%s3437_s20 + $0x40] sm:$0xff] }
  0x16   : > { %426 = vrot.lane.b32.xlu0 %v393_v5, %s3364_s24  ;;  %2940 = vst.msk [vmem:[%s3442_s23 + $0x30] sm:$0xff] %vm458_vm1, %v367_v10  ;;  %2941 = vst.msk [vmem:[%s3442_s23 + $0x38] sm:$0xff] %vm458_vm1, %v368_v11  ;;  %v370_v14 = vld [vmem:[%s3437_s20 + $0x48] sm:$0xff]  ;;  %v396_v17 = vpack.c.bf16 %v368_v11, %v367_v10  ;;  %v785_v5 = vshrl.u32 %v784_v4, 7 }
  0x17   : > { %2942 = vst.msk [vmem:[%s3442_s23 + $0x40] sm:$0xff] %vm458_vm1, %v369_v12  ;;  %v371_v15 = vld [vmem:[%s3437_s20 + $0x50] sm:$0xff]  ;;  %v372_v16 = vld [vmem:[%s3437_s20 + $0x58] sm:$0xff]  ;;  %430 = vrot.lane.b32.xlu1 %v395_v9, %s3364_s24  ;;  %v397_v27 = vpack.c.bf16 %v370_v14, %v369_v12 }
  0x18   : > { %2943 = vst.msk [vmem:[%s3442_s23 + $0x48] sm:$0xff] %vm458_vm1, %v370_v14  ;;  %2944 = vst.msk [vmem:[%s3442_s23 + $0x50] sm:$0xff] %vm458_vm1, %v371_v15  ;;  %v373_v18 = vld [vmem:[%s3437_s20 + $0x60] sm:$0xff]  ;;  %v374_v19 = vld [vmem:[%s3437_s20 + $0x68] sm:$0xff]  ;;  %v398_v31 = vpack.c.bf16 %v372_v16, %v371_v15  ;;  %v852_v6 = vsub.s32 1, %v785_v5  ;;  %v786_v8 = vsub.s32 0, %v785_v5 }
  0x19   : > { %2945 = vst.msk [vmem:[%s3442_s23 + $0x58] sm:$0xff] %vm458_vm1, %v372_v16  ;;  %v375_v20 = vld [vmem:[%s3437_s20 + $0x70] sm:$0xff]  ;;  %2946 = vst.msk [vmem:[%s3442_s23 + $0x60] sm:$0xff] %vm458_vm1, %v373_v18  ;;  %v376_v21 = vld [vmem:[%s3437_s20 + $0x78] sm:$0xff]  ;;  %v399_v40 = vpack.c.bf16 %v374_v19, %v373_v18  ;;  %v1060_v10 = vsub.s32 2, %v785_v5  ;;  %v1284_v15 = vsub.s32 3, %v785_v5 }
  0x1a   : > { %2947 = vst.msk [vmem:[%s3442_s23 + $0x68] sm:$0xff] %vm458_vm1, %v374_v19  ;;  %2948 = vst.msk [vmem:[%s3442_s23 + $0x70] sm:$0xff] %vm458_vm1, %v375_v20  ;;  %v377_v22 = vld [vmem:[%s3437_s20 + $0x80] sm:$0xff]  ;;  %v378_v23 = vld [vmem:[%s3437_s20 + $0x88] sm:$0xff]  ;;  %v400_v41 = vpack.c.bf16 %v376_v21, %v375_v20  ;;  %v1581_v18 = vsub.s32 5, %v785_v5 }
  0x1b   : > { %2949 = vst.msk [vmem:[%s3442_s23 + $0x78] sm:$0xff] %vm458_vm1, %v376_v21  ;;  %2950 = vst.msk [vmem:[%s3442_s23 + $0x80] sm:$0xff] %vm458_vm1, %v377_v22  ;;  %v379_v24 = vld [vmem:[%s3437_s20 + $0x90] sm:$0xff]  ;;  %v380_v25 = vld [vmem:[%s3437_s20 + $0x98] sm:$0xff]  ;;  %v401_v42 = vpack.c.bf16 %v378_v23, %v377_v22 }
  0x1c   : > { %2951 = vst.msk [vmem:[%s3442_s23 + $0x88] sm:$0xff] %vm458_vm1, %v378_v23  ;;  %v381_v26 = vld [vmem:[%s3437_s20 + $0xa0] sm:$0xff]  ;;  %428 = vrot.lane.b32.xlu0 %v394_v13, %s3364_s24  ;;  %2952 = vst.msk [vmem:[%s3442_s23 + $0x90] sm:$0xff] %vm458_vm1, %v379_v24  ;;  %v402_v43 = vpack.c.bf16 %v380_v25, %v379_v24  ;;  %v1369_v23 = vsub.s32 4, %v785_v5 }
  0x1d   : > { %2953 = vst.msk [vmem:[%s3442_s23 + $0x98] sm:$0xff] %vm458_vm1, %v380_v25  ;;  %v382_v28 = vld [vmem:[%s3437_s20 + $0xa8] sm:$0xff]  ;;  %2954 = vst.msk [vmem:[%s3442_s23 + $0xa0] sm:$0xff] %vm458_vm1, %v381_v26  ;;  %v383_v29 = vld [vmem:[%s3437_s20 + $0xb0] sm:$0xff]  ;;  %v1812_v25 = vsub.s32 6, %v785_v5 }
  0x1e   : > { %v384_v30 = vld [vmem:[%s3437_s20 + $0xb8] sm:$0xff]  ;;  %432 = vrot.lane.b32.xlu1 %v396_v17, %s3364_s24  ;;  %2955 = vst.msk [vmem:[%s3442_s23 + $0xa8] sm:$0xff] %vm458_vm1, %v382_v28  ;;  %2956 = vst.msk [vmem:[%s3442_s23 + $0xb0] sm:$0xff] %vm458_vm1, %v383_v29  ;;  %v403_v44 = vpack.c.bf16 %v382_v28, %v381_v26  ;;  %v1895_v26 = vsub.s32 7, %v785_v5 }
  0x1f   : > { %2957 = vst.msk [vmem:[%s3442_s23 + $0xb8] sm:$0xff] %vm458_vm1, %v384_v30  ;;  %v385_v32 = vld [vmem:[%s3437_s20 + $0xc0] sm:$0xff]  ;;  %v386_v33 = vld [vmem:[%s3437_s20 + $0xc8] sm:$0xff]  ;;  %v387_v34 = vld [vmem:[%s3437_s20 + $0xd0] sm:$0xff]  ;;  %v404_v45 = vpack.c.bf16 %v384_v30, %v383_v29 }
  0x20   : > { %2958 = vst.msk [vmem:[%s3442_s23 + $0xc0] sm:$0xff] %vm458_vm1, %v385_v32  ;;  %2959 = vst.msk [vmem:[%s3442_s23 + $0xc8] sm:$0xff] %vm458_vm1, %v386_v33  ;;  %v388_v35 = vld [vmem:[%s3437_s20 + $0xd8] sm:$0xff]  ;;  %v389_v36 = vld [vmem:[%s3437_s20 + $0xe0] sm:$0xff]  ;;  %v405_v46 = vpack.c.bf16 %v386_v33, %v385_v32 }
  0x21   : > { %2960 = vst.msk [vmem:[%s3442_s23 + $0xd0] sm:$0xff] %vm458_vm1, %v387_v34  ;;  %v390_v37 = vld [vmem:[%s3437_s20 + $0xe8] sm:$0xff]  ;;  %2961 = vst.msk [vmem:[%s3442_s23 + $0xd8] sm:$0xff] %vm458_vm1, %v388_v35  ;;  %v391_v38 = vld [vmem:[%s3437_s20 + $0xf0] sm:$0xff]  ;;  %v406_v47 = vpack.c.bf16 %v388_v35, %v387_v34 }
  0x22   : > { %2962 = vst.msk [vmem:[%s3442_s23 + $0xe0] sm:$0xff] %vm458_vm1, %v389_v36  ;;  %2963 = vst.msk [vmem:[%s3442_s23 + $0xe8] sm:$0xff] %vm458_vm1, %v390_v37  ;;  %v392_v39 = vld [vmem:[%s3437_s20 + $0xf8] sm:$0xff]  ;;  %434 = vrot.lane.b32.xlu0 %v397_v27, %s3364_s24  ;;  %v407_v48 = vpack.c.bf16 %v390_v37, %v389_v36 }
  0x23   : > { %2964 = vst.msk [vmem:[%s3442_s23 + $0xf0] sm:$0xff] %vm458_vm1, %v391_v38  ;;  %2965 = vst.msk [vmem:[%s3442_s23 + $0xf8] sm:$0xff] %vm458_vm1, %v392_v39  ;;  %436 = vrot.lane.b32.xlu1 %v398_v31, %s3364_s24  ;;  %v408_v49 = vpack.c.bf16 %v392_v39, %v391_v38  ;;  %v2611_v2 = vld [vmem:[%s5031_s7] sm:$0xf] }
  0x24   : > { %3337 = vmatprep.subr.msk.bf16.mxu1 %vm507_vm0, %v2611_v2  ;;  %v2661_v3 = vsel %vm507_vm0, %v2611_v2, 0  ;;  %v782_v7 = vld [vmem:[%s5028_s4] sm:$0xff]  ;;  %v3615_v32 = vld [vmem:[%s5028_s4 + $0x8] ss:$0 sm:$0xff] }
  0x25   : > { %3303 = vmatpush3.bf16.msra.mxu1 %v2661_v3  ;;  %v3580_v9 = vrot.slane %v782_v7, %v852_v6  ;;  %v3582_v11 = vrot.slane %v782_v7, %v786_v8  ;;  %v3584_v12 = vrot.slane %v782_v7, %v1060_v10  ;;  %v3591_v19 = vrot.slane %v782_v7, %v1284_v15  ;;  %v3599_v22 = vld [vmem:[%s5026_s2] ss:$0 sm:$0xff] }
  0x26   : > { %438 = vrot.lane.b32.xlu0 %v399_v40, %s3364_s24  ;;  %v3601_v24 = vrot.slane %v782_v7, %v1581_v18  ;;  %v3606_v28 = vld [vmem:[%s5027_s3] ss:$0 sm:$0xff]  ;;  %v3622_v36 = vrot.slane %v782_v7, %v1369_v23  ;;  %v2107_v38 = vmul.f32 0.0, %v3615_v32 }
  0x27   : > { %440 = vrot.lane.b32.xlu1 %v400_v41, %s3364_s24  ;;  %v854_v13 = vmul.f32 0.0, %v3580_v9  ;;  %v3588_v14 = vmul.f32 0.0, %v3582_v11  ;;  %v1062_v16 = vmul.f32 0.0, %v3584_v12  ;;  %v3610_v31 = vmul.f32 0.0, %v3591_v19 }
  0x28   : > { %v1585_v34 = vmul.f32 0.0, %v3601_v24 }
  0x29   : > { %v917_v17 = vrot.slane %v854_v13, 1  ;;  %v3593_v20 = vrot.slane %v1062_v16, 2 }
  0x2a   : > { %442 = vrot.lane.b32.xlu0 %v401_v42, %s3364_s24  ;;  %v3627_v42 = vrot.slane %v782_v7, %v1812_v25 }
  0x2b   : > { %444 = vrot.lane.b32.xlu1 %v402_v43, %s3364_s24  ;;  %v1011_v21 = vadd.f32 %v917_v17, %v3588_v14  ;;  %v3629_v43 = vrot.slane %v782_v7, %v1895_v26 }
  0x2d   : > { %v3618_v33 = vadd.f32 %v3593_v20, %v1011_v21 }
  0x2e   : > { %446 = vrot.lane.b32.xlu0 %v403_v44, %s3364_s24 }
  0x2f   : > { %448 = vrot.lane.b32.xlu1 %v404_v45, %s3364_s24 }
  0x32   : > { %450 = vrot.lane.b32.xlu0 %v405_v46, %s3364_s24 }
  0x33   : > { %452 = vrot.lane.b32.xlu1 %v406_v47, %s3364_s24 }
  0x36   : > { %454 = vrot.lane.b32.xlu0 %v407_v48, %s3364_s24  ;;  %v3638_v48 = vadd.f32 %v3610_v31, %v3618_v33 }
  0x37   : > { %456 = vrot.lane.b32.xlu1 %v408_v49, %s3364_s24  ;;  %v3640_v49 = vrot.slane %v1585_v34, 2 }
  0x88   : > { %v427_v50 = vpop.permute.xlu0 %426 }
  0x89   : > { %3270 = vmatprep.mubr.msk.bf16.mxu0 %vm458_vm1, %v427_v50  ;;  %v431_v51 = vpop.permute.xlu1 %430 }
  0x8e   : > { %v429_v52 = vpop.permute.xlu0 %428 }
  0x8f   : > { %3271 = vmatmul.mubr.msk.bf16.vlgmr.msra.gmra.mrb[0].mxu0 %vm458_vm1, %v429_v52  ;;  %v3646_v52 = vmul.f32 0.0, %v3627_v42 }
  0x90   : > { %3274 = vmatprep.mubr.msk.bf16.mxu0 %vm458_vm1, %v431_v51  ;;  %v433_v53 = vpop.permute.xlu1 %432 }
  0x94   : > { %v435_v54 = vpop.permute.xlu0 %434 }
  0x95   : > { %v437_v55 = vpop.permute.xlu1 %436 }
  0x97   : > { %3275 = vmatmul.mubr.msk.bf16.gmra.mrb[4].mxu0 %vm458_vm1, %v433_v53  ;;  %v3648_v53 = vrot.slane %v2107_v38, 2 }
  0x98   : > { %3278 = vmatprep.mubr.msk.bf16.mxu0 %vm458_vm1, %v435_v54  ;;  %v439_v56 = vpop.permute.xlu0 %438 }
  0x99   : > { %v441_v57 = vpop.permute.xlu1 %440 }
  0x9c   : > { %v443_v58 = vpop.permute.xlu0 %442 }
  0x9d   : > { %v445_v59 = vpop.permute.xlu1 %444 }
  0x9f   : > { %3279 = vmatmul.mubr.msk.bf16.gmra.mrb[8].mxu0 %vm458_vm1, %v437_v55 }
  0xa0   : > { %3282 = vmatprep.mubr.msk.bf16.mxu0 %vm458_vm1, %v439_v56  ;;  %v447_v60 = vpop.permute.xlu0 %446 }
  0xa1   : > { %v449_v61 = vpop.permute.xlu1 %448 }
  0xa4   : > { %v451_v62 = vpop.permute.xlu0 %450 }
  0xa5   : > { %v453_v63 = vpop.permute.xlu1 %452 }
  0xa7   : > { %3283 = vmatmul.mubr.msk.bf16.gmra.mrb[12].mxu0 %vm458_vm1, %v441_v57 }
  0xa8   : > { %3286 = vmatprep.mubr.msk.bf16.mxu0 %vm458_vm1, %v443_v58  ;;  %v455_v0 = vpop.permute.xlu0 %454 }
  0xa9   : > { %v457_v1 = vpop.permute.xlu1 %456 }
  0xaf   : > { %3287 = vmatmul.mubr.msk.bf16.gmra.mrb[16].mxu0 %vm458_vm1, %v445_v59 }
  0xb0   : > { %3290 = vmatprep.mubr.msk.bf16.mxu0 %vm458_vm1, %v447_v60 }
  0xb7   : > { %3291 = vmatmul.mubr.msk.bf16.gmra.mrb[20].mxu0 %vm458_vm1, %v449_v61 }
  0xb8   : > { %3294 = vmatprep.mubr.msk.bf16.mxu0 %vm458_vm1, %v451_v62 }
  0xbf   : > { %3295 = vmatmul.mubr.msk.bf16.gmra.mrb[24].mxu0 %vm458_vm1, %v453_v63 }
  0xc0   : > { %3298 = vmatprep.mubr.msk.bf16.mxu0 %vm458_vm1, %v455_v0 }
  0xc7   : > { %3299 = vmatmul.mubr.msk.bf16.gmra.mrb[28].mxu0 %vm458_vm1, %v457_v1 }
 0x162   : > { %v3272_v27 = vpop.f32.mrb[0].mxu0 }
 0x163   : > { %v681_v29 = vmul.f32 %v3272_v27, %v3599_v22  ;;  %v545_v30 = vpop.f32.mrb[1].mxu0 }
 0x164   : > { %v679_v35 = vmul.f32 %v3599_v22, %v545_v30  ;;  %v3273_v37 = vpop.f32.mrb[2].mxu0 }
 0x165   : > { %v720_v39 = vadd.f32 %v3606_v28, %v681_v29  ;;  %v682_v40 = vmul.f32 %v3273_v37, %v3599_v22  ;;  %v548_v41 = vpop.f32.mrb[3].mxu0 }
 0x166   : > { %v718_v44 = vadd.f32 %v3606_v28, %v679_v35  ;;  %v680_v45 = vmul.f32 %v3599_v22, %v548_v41 }
 0x167   : > { %v3633_v46 = vmax.f32 %v720_v39, 0.0  ;;  %v721_v47 = vadd.f32 %v3606_v28, %v682_v40 }
 0x168   : > { %v3642_v50 = vmax.f32 %v718_v44, 0.0  ;;  %v719_v51 = vadd.f32 %v3606_v28, %v680_v45 }
 0x169   : > { %v3650_v54 = vmax.f32 %v721_v47, 0.0  ;;  %v3654_v55 = vmul.f32 %v3627_v42, %v3633_v46  ;;  %v3658_v56 = vmul.f32 %v3629_v43, %v3633_v46  ;;  %v3662_v57 = vmul.f32 %v3615_v32, %v3633_v46 }
 0x16a   : > { %v789_v58 = vmul.f32 %v3582_v11, %v3642_v50  ;;  %v855_v59 = vmul.f32 %v3580_v9, %v3642_v50  ;;  %v1063_v60 = vmul.f32 %v3584_v12, %v3642_v50  ;;  %v1287_v61 = vmul.f32 %v3591_v19, %v3642_v50  ;;  %v3276_v62 = vpop.f32.mrb[4].mxu0 }
 0x16b   : > { %v3674_v63 = vmul.f32 %v3622_v36, %v3642_v50  ;;  %v751_v0 = vmax.f32 %v719_v51, 0.0  ;;  %v1290_v1 = vmul.f32 %v3591_v19, %v3650_v54  ;;  %v685_v2 = vmul.f32 %v3276_v62, %v3599_v22  ;;  %v561_v3 = vpop.f32.mrb[5].mxu0 }
 0x16c   : > { %v919_v4 = vrot.slane %v855_v59, 1  ;;  %v1127_v5 = vrot.slane %v1063_v60, 2  ;;  %v683_v6 = vmul.f32 %v3599_v22, %v561_v3  ;;  %v3277_v7 = vpop.f32.mrb[6].mxu0  ;;  %v1320_v8 = vadd.f32 %v1287_v61, %v3618_v33 }
 0x16d   : > { %v790_v10 = vmul.f32 %v3582_v11, %v751_v0  ;;  %v856_v13 = vmul.f32 %v3580_v9, %v751_v0  ;;  %v1064_v15 = vmul.f32 %v3584_v12, %v751_v0  ;;  %v1288_v16 = vmul.f32 %v3591_v19, %v751_v0  ;;  %v564_v17 = vpop.f32.mrb[7].mxu0 }
 0x16e   : > { %v1013_v18 = vadd.f32 %v919_v4, %v3588_v14  ;;  %v1372_v21 = vmul.f32 %v3622_v36, %v751_v0  ;;  %v1584_v23 = vmul.f32 %v3601_v24, %v751_v0  ;;  %v724_v25 = vadd.f32 %v3606_v28, %v685_v2 }
 0x16f   : > { %v920_v26 = vrot.slane %v856_v13, 1  ;;  %v1128_v27 = vrot.slane %v1064_v15, 2  ;;  %v722_v29 = vadd.f32 %v3606_v28, %v683_v6  ;;  %v686_v30 = vmul.f32 %v3277_v7, %v3599_v22 }
 0x170   : > { %v1237_v34 = vadd.f32 %v1127_v5, %v1013_v18  ;;  %v1650_v35 = vrot.slane %v1584_v23, 2  ;;  %v3691_v37 = vmax.f32 %v724_v25, 0.0  ;;  %v684_v38 = vmul.f32 %v3599_v22, %v564_v17 }
 0x171   : > { %v921_v39 = vsel %vm916_vm2, %v919_v4, %v920_v26  ;;  %v1015_v40 = vadd.f32 %v920_v26, %v790_v10  ;;  %v1129_v41 = vsel %vm1124_vm3, %v1127_v5, %v1128_v27  ;;  %v1130_v44 = vsel %vm1124_vm3, %v1128_v27, %v3593_v20 }
 0x172   : > { %v3699_v45 = vadd.f32 %v3610_v31, %v1237_v34  ;;  %v1014_v47 = vadd.f32 %v921_v39, %v789_v58  ;;  %v3701_v51 = vmax.f32 %v722_v29, 0.0  ;;  %v725_v59 = vadd.f32 %v3606_v28, %v686_v30  ;;  %v3280_v60 = vpop.f32.mrb[8].mxu0 }
 0x173   : > { %v1239_v61 = vadd.f32 %v1130_v44, %v1015_v40  ;;  %v723_v62 = vadd.f32 %v3606_v28, %v684_v38  ;;  %v689_v0 = vmul.f32 %v3280_v60, %v3599_v22  ;;  %v577_v2 = vpop.f32.mrb[9].mxu0  ;;  %v1321_v3 = vadd.f32 %v1288_v16, %v3618_v33 }
 0x174   : > { %v3707_v4 = vadd.f32 %v1129_v41, %v1014_v47  ;;  %v3709_v5 = vmax.f32 %v725_v59, 0.0  ;;  %v687_v6 = vmul.f32 %v3599_v22, %v577_v2  ;;  %v3281_v58 = vpop.f32.mrb[10].mxu0  ;;  %v1435_v7 = vrot.slane %v3674_v63, 1 }
 0x175   : > { %v3713_v10 = vadd.f32 %v1290_v1, %v1239_v61  ;;  %v3715_v13 = vmax.f32 %v723_v62, 0.0  ;;  %v728_v15 = vadd.f32 %v3606_v28, %v689_v0  ;;  %v690_v17 = vmul.f32 %v3281_v58, %v3599_v22  ;;  %v580_v18 = vpop.f32.mrb[11].mxu0 }
 0x176   : > { %v726_v33 = vadd.f32 %v3606_v28, %v687_v6  ;;  %v688_v16 = vmul.f32 %v3599_v22, %v580_v18  ;;  %v1436_v23 = vrot.slane %v1372_v21, 1  ;;  %v1531_v25 = vadd.f32 %v1435_v7, %v3638_v48 }
 0x177   : > { %v3722_v26 = vmax.f32 %v728_v15, 0.0  ;;  %v729_v63 = vadd.f32 %v3606_v28, %v690_v17  ;;  %v1583_v1 = vmul.f32 %v3601_v24, %v3642_v50  ;;  %v1653_v27 = vsel %vm1124_vm3, %v1650_v35, %v3640_v49 }
 0x178   : > { %v3729_v29 = vmax.f32 %v726_v33, 0.0  ;;  %v727_v30 = vadd.f32 %v3606_v28, %v688_v16  ;;  %v1437_v34 = vsel %vm916_vm2, %v1435_v7, %v1436_v23  ;;  %v1533_v38 = vadd.f32 %v1436_v23, %v1321_v3 }
 0x179   : > { %v3733_v21 = vmax.f32 %v729_v63, 0.0  ;;  %v1532_v48 = vadd.f32 %v1437_v34, %v1320_v8  ;;  %v1649_v39 = vrot.slane %v1583_v1, 2  ;;  %v1816_v40 = vmul.f32 %v3627_v42, %v3650_v54 }
 0x17a   : > { %v3737_v41 = vmax.f32 %v727_v30, 0.0  ;;  %v3284_v50 = vpop.f32.mrb[12].mxu0  ;;  %v1764_v44 = vadd.f32 %v1653_v27, %v1533_v38  ;;  %v1898_v47 = vmul.f32 %v3629_v43, %v3650_v54  ;;  %v1959_v59 = vrot.slane %v3658_v56, 1 }
 0x17b   : > { %v693_v60 = vmul.f32 %v3284_v50, %v3599_v22  ;;  %v593_v61 = vpop.f32.mrb[13].mxu0  ;;  %v1651_v62 = vsel %vm1124_vm3, %v1649_v39, %v1650_v35  ;;  %v1762_v0 = vadd.f32 %v1649_v39, %v1531_v25  ;;  %v2106_v8 = vmul.f32 %v3615_v32, %v3650_v54  ;;  %v3764_v39 = vld [vmem:[%s5029_s5] ss:$0 sm:$0xff] }
 0x17c   : > { %v691_v2 = vmul.f32 %v3599_v22, %v593_v61  ;;  %v3285_v3 = vpop.f32.mrb[14].mxu0  ;;  %v1763_v6 = vadd.f32 %v1651_v62, %v1532_v48  ;;  %v1847_v58 = vadd.f32 %v1816_v40, %v1764_v44  ;;  %v1960_v7 = vrot.slane %v1898_v47, 1 }
 0x17d   : > { %v732_v15 = vadd.f32 %v3606_v28, %v693_v60  ;;  %v694_v17 = vmul.f32 %v3285_v3, %v3599_v22  ;;  %v596_v56 = vpop.f32.mrb[15].mxu0  ;;  %v1845_v18 = vadd.f32 %v3646_v52, %v1762_v0  ;;  %v2167_v33 = vrot.slane %v3662_v57, 2 }
 0x17e   : > { %v730_v35 = vadd.f32 %v3606_v28, %v691_v2  ;;  %v692_v16 = vmul.f32 %v3599_v22, %v596_v56  ;;  %v1846_v23 = vadd.f32 %v3654_v55, %v1763_v6  ;;  %v1961_v25 = vsel %vm916_vm2, %v1959_v59, %v1960_v7 }
 0x17f   : > { %v3755_v63 = vmax.f32 %v732_v15, 0.0  ;;  %v733_v1 = vadd.f32 %v3606_v28, %v694_v17  ;;  %v2053_v27 = vadd.f32 %v1959_v59, %v1845_v18  ;;  %v2055_v30 = vadd.f32 %v1960_v7, %v1847_v58  ;;  %v3784_v58 = vld [vmem:[%s5030_s6] ss:$0 sm:$0xff] }
 0x180   : > { %v3758_v34 = vmax.f32 %v730_v35, 0.0  ;;  %v731_v38 = vadd.f32 %v3606_v28, %v692_v16  ;;  %v2054_v48 = vadd.f32 %v1961_v25, %v1846_v23  ;;  %v2168_v57 = vrot.slane %v2106_v8, 2 }
 0x181   : > { %v3766_v55 = vmax.f32 %v733_v1, 0.0  ;;  %v2276_v40 = vadd.f32 %v2167_v33, %v2053_v27  ;;  %v1289_v50 = vmul.f32 %v3591_v19, %v3633_v46  ;;  %v1373_v44 = vmul.f32 %v3622_v36, %v3633_v46 }
 0x182   : > { %v3772_v47 = vmax.f32 %v731_v38, 0.0  ;;  %v3288_v59 = vpop.f32.mrb[16].mxu0  ;;  %v2169_v60 = vsel %vm1124_vm3, %v2167_v33, %v2168_v57  ;;  %v2171_v61 = vsel %vm1124_vm3, %v2168_v57, %v3648_v53  ;;  %v1374_v62 = vmul.f32 %v3622_v36, %v3650_v54 }
 0x183   : > { %v697_v0 = vmul.f32 %v3288_v59, %v3599_v22  ;;  %v609_v8 = vpop.f32.mrb[17].mxu0  ;;  %v2277_v2 = vadd.f32 %v2169_v60, %v2054_v48  ;;  %v2278_v3 = vadd.f32 %v2171_v61, %v2055_v30  ;;  %v2331_v6 = vmul.f32 %v3764_v39, %v2276_v40 }
 0x184   : > { %v695_v7 = vmul.f32 %v3599_v22, %v609_v8  ;;  %v3289_v15 = vpop.f32.mrb[18].mxu0  ;;  %v1323_v17 = vadd.f32 %v1289_v50, %v3707_v4  ;;  %v1438_v56 = vrot.slane %v1373_v44, 1  ;;  %v1439_v18 = vrot.slane %v1374_v62, 1 }
 0x185   : > { %v736_v33 = vadd.f32 %v3606_v28, %v697_v0  ;;  %v698_v35 = vmul.f32 %v3289_v15, %v3599_v22  ;;  %v2332_v16 = vmul.f32 %v3764_v39, %v2277_v2  ;;  %v2333_v23 = vmul.f32 %v3764_v39, %v2278_v3  ;;  %v612_v25 = vpop.f32.mrb[19].mxu0 }
 0x186   : > { %v734_v1 = vadd.f32 %v3606_v28, %v695_v7  ;;  %v2386_v27 = vadd.f32 %v3784_v58, %v2331_v6  ;;  %v696_v30 = vmul.f32 %v3599_v22, %v612_v25  ;;  %v1440_v38 = vsel %vm916_vm2, %v1438_v56, %v1439_v18 }
 0x187   : > { %v3796_v4 = vmax.f32 %v736_v33, 0.0  ;;  %v737_v48 = vadd.f32 %v3606_v28, %v698_v35  ;;  %v2387_v57 = vadd.f32 %v3784_v58, %v2332_v16  ;;  %v2388_v40 = vadd.f32 %v3784_v58, %v2333_v23 }
 0x188   : > { %v3801_v50 = vmax.f32 %v734_v1, 0.0  ;;  %v2483_v44 = vrot.slane %v2386_v27, 7  ;;  %v735_v59 = vadd.f32 %v3606_v28, %v696_v30  ;;  %v1534_v60 = vadd.f32 %v1438_v56, %v3699_v45 }
 0x189   : > { %5045 = vst [vmem:[#allocation2_spill] sm:$0xff] %v3796_v4  ;;  %v3805_v61 = vmax.f32 %v737_v48, 0.0  ;;  %v2484_v62 = vrot.slane %v2387_v57, 7  ;;  %v2486_v0 = vrot.slane %v2388_v40, 7  ;;  %v1535_v8 = vadd.f32 %v1440_v38, %v1323_v17 }
 0x18a   : > { %5046 = vst [vmem:[#allocation3_spill] sm:$0xff] %v3801_v50  ;;  %v3807_v2 = vmax.f32 %v735_v59, 0.0  ;;  %v3292_v3 = vpop.f32.mrb[20].mxu0  ;;  %v1536_v6 = vadd.f32 %v1439_v18, %v3713_v10  ;;  %v1586_v7 = vmul.f32 %v3601_v24, %v3633_v46  ;;  %v1587_v15 = vmul.f32 %v3601_v24, %v3650_v54 }
 0x18b   : > { %5047 = vst [vmem:[#allocation4_spill] sm:$0xff] %v3805_v61  ;;  %v2485_v33 = vsel %vm2482_vm4, %v2483_v44, %v2484_v62  ;;  %v2487_v45 = vsel %vm2482_vm4, %v2484_v62, %v2486_v0  ;;  %v701_v56 = vmul.f32 %v3292_v3, %v3599_v22  ;;  %v1817_v17 = vmul.f32 %v3627_v42, %v3701_v51  ;;  %v625_v35 = vpop.f32.mrb[21].mxu0 }
 0x18c   : > { %5048 = vst [vmem:[#allocation5_spill] sm:$0xff] %v3807_v2  ;;  %v2595_v16 = vpack.c.bf16 %v2487_v45, %v2485_v33  ;;  %v1654_v23 = vrot.slane %v1586_v7, 2  ;;  %v1655_v25 = vrot.slane %v1587_v15, 2  ;;  %v1818_v10 = vmul.f32 %v3627_v42, %v3715_v13  ;;  %v3293_v18 = vpop.f32.mrb[22].mxu0 }
 0x18d   : > { %v740_v1 = vadd.f32 %v3606_v28, %v701_v56  ;;  %v1899_v27 = vmul.f32 %v3629_v43, %v3701_v51  ;;  %v1900_v30 = vmul.f32 %v3629_v43, %v3715_v13  ;;  %v2108_v38 = vmul.f32 %v3615_v32, %v3701_v51  ;;  %v3828_v48 = vpop.f32.mrb[23].mxu0 }
 0x18e   : > { %3304 = vmatprep.mubr.msk.bf16.mxu1 %vm458_vm1, %v2595_v16  ;;  %v1656_v57 = vsel %vm1124_vm3, %v1654_v23, %v1655_v25  ;;  %v1657_v40 = vsel %vm1124_vm3, %v1655_v25, %v3640_v49  ;;  %v1765_v44 = vadd.f32 %v1654_v23, %v1534_v60  ;;  %v2109_v59 = vmul.f32 %v3615_v32, %v3715_v13 }
 0x18f   : > { %v3836_v62 = vmax.f32 %v740_v1, 0.0  ;;  %v1766_v0 = vadd.f32 %v1656_v57, %v1535_v8  ;;  %v1767_v3 = vadd.f32 %v1657_v40, %v1536_v6  ;;  %v1962_v7 = vrot.slane %v1899_v27, 1 }
 0x190   : > { %v1848_v15 = vadd.f32 %v3646_v52, %v1765_v44  ;;  %v1963_v33 = vrot.slane %v1900_v30, 1  ;;  %v2172_v45 = vrot.slane %v2108_v38, 2  ;;  %v2173_v56 = vrot.slane %v2109_v59, 2 }
 0x191   : > { %5049 = vst [vmem:[#allocation6_spill] sm:$0xff] %v3836_v62  ;;  %v1849_v16 = vadd.f32 %v1817_v17, %v1766_v0  ;;  %v1850_v61 = vadd.f32 %v1818_v10, %v1767_v3  ;;  %v699_v4 = vmul.f32 %v3599_v22, %v625_v35  ;;  %v702_v25 = vmul.f32 %v3293_v18, %v3599_v22 }
 0x192   : > { %v1964_v60 = vsel %vm916_vm2, %v1962_v7, %v1963_v33  ;;  %v2056_v23 = vadd.f32 %v1962_v7, %v1848_v15  ;;  %v2174_v1 = vsel %vm1124_vm3, %v2172_v45, %v2173_v56  ;;  %v2175_v8 = vsel %vm1124_vm3, %v2173_v56, %v3648_v53  ;;  %v3845_v6 = vpop.f32.mrb[24].mxu0 }
 0x193   : > { %v2057_v27 = vadd.f32 %v1964_v60, %v1849_v16  ;;  %v2058_v30 = vadd.f32 %v1963_v33, %v1850_v61  ;;  %v738_v38 = vadd.f32 %v3606_v28, %v699_v4  ;;  %v741_v17 = vadd.f32 %v3606_v28, %v702_v25  ;;  %v3849_v10 = vpop.f32.mrb[25].mxu0 }
 0x194   : > { %v2279_v35 = vadd.f32 %v2172_v45, %v2056_v23  ;;  %v791_v18 = vmul.f32 %v3582_v11, %v3633_v46  ;;  %v792_v57 = vmul.f32 %v3582_v11, %v3650_v54  ;;  %v857_v40 = vmul.f32 %v3580_v9, %v3633_v46  ;;  %v3857_v44 = vpop.f32.mrb[26].mxu0 }
 0x195   : > { %v2280_v59 = vadd.f32 %v2174_v1, %v2057_v27  ;;  %v2281_v61 = vadd.f32 %v2175_v8, %v2058_v30  ;;  %v3859_v0 = vmax.f32 %v738_v38, 0.0  ;;  %v3861_v4 = vmax.f32 %v741_v17, 0.0  ;;  %v3863_v3 = vpop.f32.mrb[27].mxu0 }
 0x196   : > { %v2334_v7 = vmul.f32 %v3764_v39, %v2279_v35  ;;  %v858_v15 = vmul.f32 %v3580_v9, %v3650_v54  ;;  %v922_v33 = vrot.slane %v857_v40, 1  ;;  %v1065_v45 = vmul.f32 %v3584_v12, %v3633_v46 }
 0x197   : > { %5050 = vst [vmem:[#allocation7_spill] sm:$0xff] %v3859_v0  ;;  %5051 = vst [vmem:[#allocation8_spill] sm:$0xff] %v3861_v4  ;;  %v2335_v56 = vmul.f32 %v3764_v39, %v2280_v59  ;;  %v2336_v16 = vmul.f32 %v3764_v39, %v2281_v61  ;;  %v1066_v25 = vmul.f32 %v3584_v12, %v3650_v54 }
 0x198   : > { %v1291_v60 = vmul.f32 %v3591_v19, %v3701_v51  ;;  %v2389_v23 = vadd.f32 %v3784_v58, %v2334_v7  ;;  %v923_v1 = vrot.slane %v858_v15, 1  ;;  %v1016_v8 = vadd.f32 %v922_v33, %v3588_v14 }
 0x199   : > { %v1131_v27 = vrot.slane %v1065_v45, 2  ;;  %v2390_v30 = vadd.f32 %v3784_v58, %v2335_v56  ;;  %v2391_v46 = vadd.f32 %v3784_v58, %v2336_v16  ;;  %v1132_v38 = vrot.slane %v1066_v25, 2 }
 0x19a   : > { %v1292_v17 = vmul.f32 %v3591_v19, %v3715_v13  ;;  %v2488_v35 = vrot.slane %v2389_v23, 7  ;;  %v924_v54 = vsel %vm916_vm2, %v922_v33, %v923_v1  ;;  %v1018_v40 = vadd.f32 %v923_v1, %v792_v57  ;;  %v3883_v61 = vpop.f32.mrb[28].mxu0 }
 0x19b   : > { %v1240_v59 = vadd.f32 %v1131_v27, %v1016_v8  ;;  %v2489_v7 = vrot.slane %v2390_v30, 7  ;;  %v2491_v15 = vrot.slane %v2391_v46, 7  ;;  %v1017_v4 = vadd.f32 %v924_v54, %v791_v18  ;;  %v3886_v62 = vpop.f32.mrb[29].mxu0 }
 0x19c   : > { %v1133_v45 = vsel %vm1124_vm3, %v1131_v27, %v1132_v38  ;;  %v1134_v56 = vsel %vm1124_vm3, %v1132_v38, %v3593_v20  ;;  %v1375_v25 = vmul.f32 %v3622_v36, %v3701_v51  ;;  %v1376_v57 = vmul.f32 %v3622_v36, %v3715_v13  ;;  %v3895_v33 = vpop.f32.mrb[30].mxu0 }
 0x19d   : > { %v1325_v16 = vadd.f32 %v3610_v31, %v1240_v59  ;;  %v2490_v23 = vsel %vm2482_vm4, %v2488_v35, %v2489_v7  ;;  %v2492_v18 = vsel %vm2482_vm4, %v2489_v7, %v2491_v15  ;;  %v1241_v1 = vadd.f32 %v1133_v45, %v1017_v4  ;;  %v3899_v27 = vpop.f32.mrb[31].mxu0 }
 0x19e   : > { %v1242_v8 = vadd.f32 %v1134_v56, %v1018_v40  ;;  %5052 = vst [vmem:[#allocation9_spill] sm:$0xff] %v3899_v27  ;;  %v2596_v30 = vpack.c.bf16 %v2492_v18, %v2490_v23  ;;  %v1441_v46 = vrot.slane %v1375_v25, 1  ;;  %v1442_v38 = vrot.slane %v1376_v57, 1 }
 0x19f   : > { %v1588_v54 = vmul.f32 %v3601_v24, %v3701_v51  ;;  %v1326_v59 = vadd.f32 %v1291_v60, %v1241_v1  ;;  %v1589_v2 = vmul.f32 %v3601_v24, %v3715_v13  ;;  %v1819_v35 = vmul.f32 %v3627_v42, %v3691_v37 }
 0x1a0   : > { %v1327_v0 = vadd.f32 %v1292_v17, %v1242_v8  ;;  %3305 = vmatmul.mubr.msk.bf16.vlgmr.msra.gmra.mrb[0].mxu1 %vm458_vm1, %v2596_v30  ;;  %v1443_v4 = vsel %vm916_vm2, %v1441_v46, %v1442_v38  ;;  %v1537_v40 = vadd.f32 %v1441_v46, %v1325_v16  ;;  %v1820_v15 = vmul.f32 %v3627_v42, %v3709_v5 }
 0x1a1   : > { %v1658_v7 = vrot.slane %v1588_v54, 2  ;;  %v1538_v45 = vadd.f32 %v1443_v4, %v1326_v59  ;;  %v1659_v25 = vrot.slane %v1589_v2, 2  ;;  %v1901_v60 = vmul.f32 %v3629_v43, %v3691_v37 }
 0x1a2   : > { %v1539_v56 = vadd.f32 %v1442_v38, %v1327_v0  ;;  %v1902_v57 = vmul.f32 %v3629_v43, %v3709_v5  ;;  %v2110_v23 = vmul.f32 %v3615_v32, %v3691_v37  ;;  %v2111_v16 = vmul.f32 %v3615_v32, %v3709_v5 }
 0x1a3   : > { %v1768_v17 = vadd.f32 %v1658_v7, %v1537_v40  ;;  %v1660_v18 = vsel %vm1124_vm3, %v1658_v7, %v1659_v25  ;;  %v1661_v1 = vsel %vm1124_vm3, %v1659_v25, %v3640_v49  ;;  %v1965_v0 = vrot.slane %v1901_v60, 1 }
 0x1a4   : > { %v700_v2 = vmul.f32 %v3599_v22, %v3828_v48  ;;  %v1769_v8 = vadd.f32 %v1660_v18, %v1538_v45  ;;  %v1770_v30 = vadd.f32 %v1661_v1, %v1539_v56  ;;  %v1966_v38 = vrot.slane %v1902_v57, 1 }
 0x1a5   : > { %v1851_v46 = vadd.f32 %v3646_v52, %v1768_v17  ;;  %v2176_v54 = vrot.slane %v2110_v23, 2  ;;  %v2177_v59 = vrot.slane %v2111_v16, 2  ;;  %v705_v40 = vmul.f32 %v3845_v6, %v3599_v22 }
 0x1a6   : > { %v739_v4 = vadd.f32 %v3606_v28, %v700_v2  ;;  %v1852_v7 = vadd.f32 %v1819_v35, %v1769_v8  ;;  %v1853_v50 = vadd.f32 %v1820_v15, %v1770_v30  ;;  %v1967_v25 = vsel %vm916_vm2, %v1965_v0, %v1966_v38 }
 0x1a7   : > { %v2059_v60 = vadd.f32 %v1965_v0, %v1851_v46  ;;  %v2178_v27 = vsel %vm1124_vm3, %v2176_v54, %v2177_v59  ;;  %v2179_v48 = vsel %vm1124_vm3, %v2177_v59, %v3648_v53  ;;  %v744_v56 = vadd.f32 %v3606_v28, %v705_v40 }
 0x1a8   : > { %v3932_v45 = vmax.f32 %v739_v4, 0.0  ;;  %v2060_v17 = vadd.f32 %v1967_v25, %v1852_v7  ;;  %v2061_v57 = vadd.f32 %v1966_v38, %v1853_v50  ;;  %v793_v6 = vmul.f32 %v3582_v11, %v3701_v51 }
 0x1a9   : > { %v2282_v23 = vadd.f32 %v2176_v54, %v2059_v60  ;;  %v3937_v35 = vmax.f32 %v744_v56, 0.0  ;;  %v794_v15 = vmul.f32 %v3582_v11, %v3715_v13  ;;  %v859_v16 = vmul.f32 %v3580_v9, %v3701_v51 }
 0x1aa   : > { %v860_v18 = vmul.f32 %v3580_v9, %v3715_v13  ;;  %v2283_v1 = vadd.f32 %v2178_v27, %v2060_v17  ;;  %v2284_v0 = vadd.f32 %v2179_v48, %v2061_v57  ;;  %v1067_v50 = vmul.f32 %v3584_v12, %v3701_v51 }
 0x1ab   : > { %v2337_v2 = vmul.f32 %v3764_v39, %v2282_v23  ;;  %v925_v8 = vrot.slane %v859_v16, 1  ;;  %v1068_v46 = vmul.f32 %v3584_v12, %v3715_v13  ;;  %v1293_v38 = vmul.f32 %v3591_v19, %v3691_v37 }
 0x1ac   : > { %v926_v30 = vrot.slane %v860_v18, 1  ;;  %v2338_v54 = vmul.f32 %v3764_v39, %v2283_v1  ;;  %v2339_v59 = vmul.f32 %v3764_v39, %v2284_v0  ;;  %v1135_v4 = vrot.slane %v1067_v50, 2 }
 0x1ad   : > { %v2392_v27 = vadd.f32 %v3784_v58, %v2337_v2  ;;  %v1019_v7 = vadd.f32 %v925_v8, %v3588_v14  ;;  %v1136_v25 = vrot.slane %v1068_v46, 2  ;;  %v1294_v16 = vmul.f32 %v3591_v19, %v3709_v5 }
 0x1ae   : > { %v927_v40 = vsel %vm916_vm2, %v925_v8, %v926_v30  ;;  %v1021_v51 = vadd.f32 %v926_v30, %v794_v15  ;;  %v2393_v60 = vadd.f32 %v3784_v58, %v2338_v54  ;;  %v2394_v13 = vadd.f32 %v3784_v58, %v2339_v59 }
 0x1af   : > { %v2493_v48 = vrot.slane %v2392_v27, 7  ;;  %v1020_v56 = vadd.f32 %v927_v40, %v793_v6  ;;  %v1137_v17 = vsel %vm1124_vm3, %v1135_v4, %v1136_v25  ;;  %v1138_v57 = vsel %vm1124_vm3, %v1136_v25, %v3593_v20 }
 0x1b0   : > { %v1243_v23 = vadd.f32 %v1135_v4, %v1019_v7  ;;  %v2494_v18 = vrot.slane %v2393_v60, 7  ;;  %v2496_v1 = vrot.slane %v2394_v13, 7  ;;  %v1245_v15 = vadd.f32 %v1138_v57, %v1021_v51 }
 0x1b1   : > { %v1244_v0 = vadd.f32 %v1137_v17, %v1020_v56  ;;  %v1377_v50 = vmul.f32 %v3622_v36, %v3691_v37  ;;  %v1378_v6 = vmul.f32 %v3622_v36, %v3709_v5  ;;  %v1590_v8 = vmul.f32 %v3601_v24, %v3691_v37 }
 0x1b2   : > { %v1328_v2 = vadd.f32 %v3610_v31, %v1243_v23  ;;  %v2495_v30 = vsel %vm2482_vm4, %v2493_v48, %v2494_v18  ;;  %v2497_v46 = vsel %vm2482_vm4, %v2494_v18, %v2496_v1  ;;  %v1330_v59 = vadd.f32 %v1294_v16, %v1245_v15 }
 0x1b3   : > { %v1329_v54 = vadd.f32 %v1293_v38, %v1244_v0  ;;  %v2597_v27 = vpack.c.bf16 %v2497_v46, %v2495_v30  ;;  %v1444_v4 = vrot.slane %v1377_v50, 1  ;;  %v1445_v40 = vrot.slane %v1378_v6, 1 }
 0x1b4   : > { %v1591_v7 = vmul.f32 %v3601_v24, %v3709_v5  ;;  %v1662_v51 = vrot.slane %v1590_v8, 2  ;;  %v1821_v25 = vmul.f32 %v3627_v42, %v3729_v29  ;;  %v1822_v60 = vmul.f32 %v3627_v42, %v3737_v41 }
 0x1b5   : > { %v1903_v13 = vmul.f32 %v3629_v43, %v3729_v29  ;;  %3308 = vmatprep.mubr.msk.bf16.mxu1 %vm458_vm1, %v2597_v27  ;;  %v1446_v38 = vsel %vm916_vm2, %v1444_v4, %v1445_v40  ;;  %v1540_v48 = vadd.f32 %v1444_v4, %v1328_v2  ;;  %v1542_v56 = vadd.f32 %v1445_v40, %v1330_v59 }
 0x1b6   : > { %v1663_v17 = vrot.slane %v1591_v7, 2  ;;  %v1541_v57 = vadd.f32 %v1446_v38, %v1329_v54  ;;  %v1904_v23 = vmul.f32 %v3629_v43, %v3737_v41  ;;  %v2112_v18 = vmul.f32 %v3615_v32, %v3729_v29 }
 0x1b7   : > { %v1968_v16 = vrot.slane %v1903_v13, 1  ;;  %v1771_v15 = vadd.f32 %v1662_v51, %v1540_v48  ;;  %v2113_v50 = vmul.f32 %v3615_v32, %v3737_v41  ;;  %v703_v59 = vmul.f32 %v3599_v22, %v3849_v10 }
 0x1b8   : > { %v1664_v1 = vsel %vm1124_vm3, %v1662_v51, %v1663_v17  ;;  %v1665_v0 = vsel %vm1124_vm3, %v1663_v17, %v3640_v49  ;;  %v1969_v8 = vrot.slane %v1904_v23, 1  ;;  %v2180_v30 = vrot.slane %v2112_v18, 2 }
 0x1b9   : > { %v1772_v2 = vadd.f32 %v1664_v1, %v1541_v57  ;;  %v1773_v6 = vadd.f32 %v1665_v0, %v1542_v56  ;;  %v1854_v46 = vadd.f32 %v3646_v52, %v1771_v15  ;;  %v2181_v54 = vrot.slane %v2113_v50, 2 }
 0x1ba   : > { %v706_v27 = vmul.f32 %v3857_v44, %v3599_v22  ;;  %v1970_v7 = vsel %vm916_vm2, %v1968_v16, %v1969_v8  ;;  %v795_v51 = vmul.f32 %v3582_v11, %v3691_v37  ;;  %v742_v56 = vadd.f32 %v3606_v28, %v703_v59 }
 0x1bb   : > { %v1855_v4 = vadd.f32 %v1821_v25, %v1772_v2  ;;  %v1856_v40 = vadd.f32 %v1822_v60, %v1773_v6  ;;  %v2062_v13 = vadd.f32 %v1968_v16, %v1854_v46  ;;  %v2182_v38 = vsel %vm1124_vm3, %v2180_v30, %v2181_v54 }
 0x1bc   : > { %v2183_v48 = vsel %vm1124_vm3, %v2181_v54, %v3648_v53  ;;  %v745_v57 = vadd.f32 %v3606_v28, %v706_v27  ;;  %v796_v44 = vmul.f32 %v3582_v11, %v3709_v5  ;;  %v4007_v60 = vmax.f32 %v742_v56, 0.0 }
 0x1bd   : > { %v2063_v17 = vadd.f32 %v1970_v7, %v1855_v4  ;;  %v2064_v10 = vadd.f32 %v1969_v8, %v1856_v40  ;;  %v2285_v25 = vadd.f32 %v2180_v30, %v2062_v13  ;;  %v861_v23 = vmul.f32 %v3580_v9, %v3691_v37 }
 0x1be   : > { %v862_v16 = vmul.f32 %v3580_v9, %v3709_v5  ;;  %v4013_v0 = vmax.f32 %v745_v57, 0.0  ;;  %v1069_v15 = vmul.f32 %v3584_v12, %v3691_v37  ;;  %v1070_v8 = vmul.f32 %v3584_v12, %v3709_v5 }
 0x1bf   : > { %v2286_v18 = vadd.f32 %v2182_v38, %v2063_v17  ;;  %v2287_v1 = vadd.f32 %v2183_v48, %v2064_v10  ;;  %v2340_v50 = vmul.f32 %v3764_v39, %v2285_v25  ;;  %v928_v2 = vrot.slane %v861_v23, 1 }
 0x1c0   : > { %v929_v6 = vrot.slane %v862_v16, 1  ;;  %v1139_v54 = vrot.slane %v1069_v15, 2  ;;  %v1295_v59 = vmul.f32 %v3591_v19, %v3729_v29  ;;  %v1140_v38 = vrot.slane %v1070_v8, 2 }
 0x1c1   : > { %v2341_v30 = vmul.f32 %v3764_v39, %v2286_v18  ;;  %v2342_v46 = vmul.f32 %v3764_v39, %v2287_v1  ;;  %v2395_v27 = vadd.f32 %v3784_v58, %v2340_v50  ;;  %v1022_v37 = vadd.f32 %v928_v2, %v3588_v14 }
 0x1c2   : > { %v930_v4 = vsel %vm916_vm2, %v928_v2, %v929_v6  ;;  %v1024_v40 = vadd.f32 %v929_v6, %v796_v44  ;;  %v1296_v17 = vmul.f32 %v3591_v19, %v3737_v41  ;;  %v1379_v10 = vmul.f32 %v3622_v36, %v3729_v29 }
 0x1c3   : > { %v2396_v7 = vadd.f32 %v3784_v58, %v2341_v30  ;;  %v2397_v13 = vadd.f32 %v3784_v58, %v2342_v46  ;;  %v1023_v5 = vadd.f32 %v930_v4, %v795_v51  ;;  %v2498_v48 = vrot.slane %v2395_v27, 7 }
 0x1c4   : > { %v1246_v56 = vadd.f32 %v1139_v54, %v1022_v37  ;;  %v1141_v23 = vsel %vm1124_vm3, %v1139_v54, %v1140_v38  ;;  %v1142_v44 = vsel %vm1124_vm3, %v1140_v38, %v3593_v20  ;;  %v1380_v1 = vmul.f32 %v3622_v36, %v3737_v41 }
 0x1c5   : > { %v2499_v57 = vrot.slane %v2396_v7, 7  ;;  %v2501_v25 = vrot.slane %v2397_v13, 7  ;;  %v1247_v16 = vadd.f32 %v1141_v23, %v1023_v5  ;;  %v1248_v18 = vadd.f32 %v1142_v44, %v1024_v40 }
 0x1c6   : > { %v1331_v51 = vadd.f32 %v3610_v31, %v1246_v56  ;;  %v1447_v2 = vrot.slane %v1379_v10, 1  ;;  %v1592_v6 = vmul.f32 %v3601_v24, %v3729_v29  ;;  %v1448_v54 = vrot.slane %v1380_v1, 1 }
 0x1c7   : > { %v2500_v15 = vsel %vm2482_vm4, %v2498_v48, %v2499_v57  ;;  %v2502_v50 = vsel %vm2482_vm4, %v2499_v57, %v2501_v25  ;;  %v1332_v30 = vadd.f32 %v1295_v59, %v1247_v16  ;;  %v1333_v46 = vadd.f32 %v1296_v17, %v1248_v18 }
 0x1c8   : > { %v2598_v8 = vpack.c.bf16 %v2502_v50, %v2500_v15  ;;  %v1543_v27 = vadd.f32 %v1447_v2, %v1331_v51  ;;  %v1593_v4 = vmul.f32 %v3601_v24, %v3737_v41  ;;  %v1666_v37 = vrot.slane %v1592_v6, 2 }
 0x1c9   : > { %v1823_v40 = vmul.f32 %v3627_v42, %v3722_v26  ;;  %v1449_v7 = vsel %vm916_vm2, %v1447_v2, %v1448_v54  ;;  %v1545_v13 = vadd.f32 %v1448_v54, %v1333_v46  ;;  %v1824_v5 = vmul.f32 %v3627_v42, %v3733_v21 }
 0x1ca   : > { %3309 = vmatmul.mubr.msk.bf16.gmra.mrb[4].mxu1 %vm458_vm1, %v2598_v8  ;;  %v1905_v59 = vmul.f32 %v3629_v43, %v3722_v26  ;;  %v1544_v38 = vadd.f32 %v1449_v7, %v1332_v30  ;;  %v1667_v48 = vrot.slane %v1593_v4, 2  ;;  %v1774_v56 = vadd.f32 %v1666_v37, %v1543_v27 }
 0x1cb   : > { %v1906_v17 = vmul.f32 %v3629_v43, %v3733_v21  ;;  %v2114_v57 = vmul.f32 %v3615_v32, %v3722_v26  ;;  %v2115_v25 = vmul.f32 %v3615_v32, %v3733_v21  ;;  %v704_v23 = vmul.f32 %v3599_v22, %v3863_v3 }
 0x1cc   : > { %v1971_v10 = vrot.slane %v1905_v59, 1  ;;  %v1668_v44 = vsel %vm1124_vm3, %v1666_v37, %v1667_v48  ;;  %v1669_v16 = vsel %vm1124_vm3, %v1667_v48, %v3640_v49  ;;  %v1857_v18 = vadd.f32 %v3646_v52, %v1774_v56 }
 0x1cd   : > { %v1972_v51 = vrot.slane %v1906_v17, 1  ;;  %v1775_v1 = vadd.f32 %v1668_v44, %v1544_v38  ;;  %v1776_v15 = vadd.f32 %v1669_v16, %v1545_v13  ;;  %v2184_v50 = vrot.slane %v2114_v57, 2 }
 0x1ce   : > { %v2185_v2 = vrot.slane %v2115_v25, 2  ;;  %v2065_v8 = vadd.f32 %v1971_v10, %v1857_v18  ;;  %v743_v32 = vadd.f32 %v3606_v28, %v704_v23  ;;  %v709_v3 = vmul.f32 %v3883_v61, %v3599_v22 }
 0x1cf   : > { %v1973_v6 = vsel %vm916_vm2, %v1971_v10, %v1972_v51  ;;  %v1858_v30 = vadd.f32 %v1823_v40, %v1775_v1  ;;  %v1859_v46 = vadd.f32 %v1824_v5, %v1776_v15  ;;  %v797_v13 = vmul.f32 %v3582_v11, %v3729_v29 }
 0x1d0   : > { %v2186_v54 = vsel %vm1124_vm3, %v2184_v50, %v2185_v2  ;;  %v2187_v27 = vsel %vm1124_vm3, %v2185_v2, %v3648_v53  ;;  %v2288_v4 = vadd.f32 %v2184_v50, %v2065_v8  ;;  %v4072_v37 = vmax.f32 %v743_v32, 0.0 }
 0x1d1   : > { %v748_v7 = vadd.f32 %v3606_v28, %v709_v3  ;;  %v2066_v59 = vadd.f32 %v1973_v6, %v1858_v30  ;;  %v2067_v38 = vadd.f32 %v1972_v51, %v1859_v46  ;;  %v798_v22 = vmul.f32 %v3582_v11, %v3737_v41 }
 0x1d2   : > { %v863_v61 = vmul.f32 %v3580_v9, %v3729_v29  ;;  %v2343_v40 = vmul.f32 %v3764_v39, %v2288_v4  ;;  %v864_v48 = vmul.f32 %v3580_v9, %v3737_v41  ;;  %v1071_v28 = vmul.f32 %v3584_v12, %v3729_v29 }
 0x1d3   : > { %v4082_v5 = vmax.f32 %v748_v7, 0.0  ;;  %v2289_v56 = vadd.f32 %v2186_v54, %v2066_v59  ;;  %v2290_v17 = vadd.f32 %v2187_v27, %v2067_v38  ;;  %v1072_v57 = vmul.f32 %v3584_v12, %v3737_v41 }
 0x1d4   : > { %v931_v10 = vrot.slane %v863_v61, 1  ;;  %v2398_v25 = vadd.f32 %v3784_v58, %v2343_v40  ;;  %v932_v2 = vrot.slane %v864_v48, 1  ;;  %v1143_v3 = vrot.slane %v1071_v28, 2 }
 0x1d5   : > { %v4093_v23 = vmul.f32 %v3591_v19, %v4082_v5  ;;  %v4097_v44 = vmul.f32 %v3622_v36, %v4082_v5  ;;  %v4101_v16 = vmul.f32 %v3601_v24, %v4082_v5  ;;  %v2344_v29 = vmul.f32 %v3764_v39, %v2289_v56 }
 0x1d6   : > { %v2345_v18 = vmul.f32 %v3764_v39, %v2290_v17  ;;  %v4107_v41 = vmul.f32 %v3627_v42, %v4082_v5  ;;  %v4111_v51 = vmul.f32 %v3629_v43, %v4082_v5  ;;  %v2503_v1 = vrot.slane %v2398_v25, 7 }
 0x1d7   : > { %v5043_v15 = vrot.slane %v4097_v44, 1  ;;  %v2399_v6 = vadd.f32 %v3784_v58, %v2344_v29  ;;  %v1025_v32 = vadd.f32 %v931_v10, %v3588_v14  ;;  %v933_v30 = vsel %vm916_vm2, %v931_v10, %v932_v2 }
 0x1d8   : > { %v2400_v8 = vadd.f32 %v3784_v58, %v2345_v18  ;;  %v1027_v46 = vadd.f32 %v932_v2, %v798_v22  ;;  %v1144_v54 = vrot.slane %v1072_v57, 2  ;;  %v1297_v27 = vmul.f32 %v3591_v19, %v3722_v26 }
 0x1d9   : > { %v2504_v4 = vrot.slane %v2399_v6, 7  ;;  %v1026_v59 = vadd.f32 %v933_v30, %v797_v13  ;;  %v1249_v38 = vadd.f32 %v1143_v3, %v1025_v32  ;;  %v1298_v48 = vmul.f32 %v3591_v19, %v3733_v21 }
 0x1da   : > { %v2506_v7 = vrot.slane %v2400_v8, 7  ;;  %v1145_v61 = vsel %vm1124_vm3, %v1143_v3, %v1144_v54  ;;  %v1146_v40 = vsel %vm1124_vm3, %v1144_v54, %v3593_v20  ;;  %v1381_v28 = vmul.f32 %v3622_v36, %v3722_v26 }
 0x1db   : > { %v2505_v22 = vsel %vm2482_vm4, %v2503_v1, %v2504_v4  ;;  %v1250_v17 = vadd.f32 %v1145_v61, %v1026_v59  ;;  %v1251_v10 = vadd.f32 %v1146_v40, %v1027_v46  ;;  %v1334_v13 = vadd.f32 %v3610_v31, %v1249_v38  ;;  %v4150_v38 = vld [vmem:[%s5028_s4 + $0x8] ss:$0 sm:$0xff] }
 0x1dc   : > { %v2507_v56 = vsel %vm2482_vm4, %v2504_v4, %v2506_v7  ;;  %v1382_v25 = vmul.f32 %v3622_v36, %v3733_v21  ;;  %v1450_v29 = vrot.slane %v1381_v28, 1  ;;  %v1594_v6 = vmul.f32 %v3601_v24, %v3722_v26 }
 0x1dd   : > { %v2599_v57 = vpack.c.bf16 %v2507_v56, %v2505_v22  ;;  %v1335_v18 = vadd.f32 %v1297_v27, %v1250_v17  ;;  %v1336_v2 = vadd.f32 %v1298_v48, %v1251_v10  ;;  %v1595_v8 = vmul.f32 %v3601_v24, %v3733_v21 }
 0x1de   : > { %v1451_v1 = vrot.slane %v1382_v25, 1  ;;  %v1546_v32 = vadd.f32 %v1450_v29, %v1334_v13  ;;  %v1825_v3 = vmul.f32 %v3627_v42, %v3758_v34  ;;  %v1826_v30 = vmul.f32 %v3627_v42, %v3772_v47 }
 0x1df   : > { %3312 = vmatprep.mubr.msk.bf16.mxu1 %vm458_vm1, %v2599_v57  ;;  %v1670_v46 = vrot.slane %v1594_v6, 2  ;;  %v1671_v54 = vrot.slane %v1595_v8, 2  ;;  %v1907_v27 = vmul.f32 %v3629_v43, %v3758_v34  ;;  %v1908_v4 = vmul.f32 %v3629_v43, %v3772_v47  ;;  %v4163_v6 = vld [vmem:[%s5026_s2] ss:$0 sm:$0xff] }
 0x1e0   : > { %v1452_v7 = vsel %vm916_vm2, %v1450_v29, %v1451_v1  ;;  %v1548_v59 = vadd.f32 %v1451_v1, %v1336_v2  ;;  %v2116_v61 = vmul.f32 %v4150_v38, %v3758_v34  ;;  %v2117_v40 = vmul.f32 %v4150_v38, %v3772_v47 }
 0x1e1   : > { %v1547_v48 = vadd.f32 %v1452_v7, %v1335_v18  ;;  %v1672_v28 = vsel %vm1124_vm3, %v1670_v46, %v1671_v54  ;;  %v1673_v22 = vsel %vm1124_vm3, %v1671_v54, %v3640_v49  ;;  %v1777_v56 = vadd.f32 %v1670_v46, %v1546_v32 }
 0x1e2   : > { %v1779_v17 = vadd.f32 %v1673_v22, %v1548_v59  ;;  %v1974_v10 = vrot.slane %v1907_v27, 1  ;;  %v1975_v57 = vrot.slane %v1908_v4, 1  ;;  %v2188_v13 = vrot.slane %v2116_v61, 2 }
 0x1e3   : > { %v1778_v25 = vadd.f32 %v1672_v28, %v1547_v48  ;;  %v1860_v29 = vadd.f32 %v3646_v52, %v1777_v56  ;;  %v2189_v2 = vrot.slane %v2117_v40, 2  ;;  %v707_v18 = vmul.f32 %v4163_v6, %v3886_v62  ;;  %v4178_v62 = vld [vmem:[%s5027_s3] ss:$0 sm:$0xff] }
 0x1e4   : > { %v1862_v8 = vadd.f32 %v1826_v30, %v1779_v17  ;;  %v1976_v1 = vsel %vm916_vm2, %v1974_v10, %v1975_v57  ;;  %v710_v32 = vmul.f32 %v4163_v6, %v3895_v33  ;;  %v799_v46 = vmul.f32 %v3582_v11, %v3722_v26 }
 0x1e5   : > { %v1861_v54 = vadd.f32 %v1825_v3, %v1778_v25  ;;  %v2068_v27 = vadd.f32 %v1974_v10, %v1860_v29  ;;  %v2190_v4 = vsel %vm1124_vm3, %v2188_v13, %v2189_v2  ;;  %v2191_v7 = vsel %vm1124_vm3, %v2189_v2, %v3648_v53 }
 0x1e6   : > { %v2070_v59 = vadd.f32 %v1975_v57, %v1862_v8  ;;  %v746_v30 = vadd.f32 %v4178_v62, %v707_v18  ;;  %v749_v33 = vadd.f32 %v4178_v62, %v710_v32  ;;  %v800_v61 = vmul.f32 %v3582_v11, %v3733_v21 }
 0x1e7   : > { %v2069_v3 = vadd.f32 %v1976_v1, %v1861_v54  ;;  %v2291_v40 = vadd.f32 %v2188_v13, %v2068_v27  ;;  %v865_v48 = vmul.f32 %v3580_v9, %v3722_v26  ;;  %v866_v28 = vmul.f32 %v3580_v9, %v3733_v21 }
 0x1e8   : > { %v2293_v22 = vadd.f32 %v2191_v7, %v2070_v59  ;;  %v4188_v56 = vmax.f32 %v746_v30, 0.0  ;;  %v781_v17 = vmax.f32 %v749_v33, 0.0  ;;  %v1073_v10 = vmul.f32 %v3584_v12, %v3722_v26 }
 0x1e9   : > { %v2292_v57 = vadd.f32 %v2190_v4, %v2069_v3  ;;  %v2346_v25 = vmul.f32 %v3764_v39, %v2291_v40  ;;  %v934_v29 = vrot.slane %v865_v48, 1  ;;  %v935_v2 = vrot.slane %v866_v28, 1 }
 0x1ea   : > { %v2348_v13 = vmul.f32 %v3764_v39, %v2293_v22  ;;  %v4195_v18 = vmul.f32 %v3591_v19, %v781_v17  ;;  %v4198_v8 = vmul.f32 %v3622_v36, %v781_v17  ;;  %v4201_v1 = vmul.f32 %v3601_v24, %v781_v17 }
 0x1eb   : > { %v2347_v32 = vmul.f32 %v3764_v39, %v2292_v57  ;;  %v2401_v26 = vadd.f32 %v3784_v58, %v2346_v25  ;;  %v4206_v54 = vmul.f32 %v3627_v42, %v781_v17  ;;  %v4209_v27 = vmul.f32 %v3629_v43, %v781_v17 }
 0x1ec   : > { %5053 = vst [vmem:[#allocation10_spill] sm:$0xff] %v4198_v8  ;;  %v2403_v4 = vadd.f32 %v3784_v58, %v2348_v13  ;;  %v5042_v7 = vrot.slane %v4198_v8, 1  ;;  %v4215_v30 = vmul.f32 %v4150_v38, %v781_v17  ;;  %v936_v3 = vsel %vm916_vm2, %v934_v29, %v935_v2 }
 0x1ed   : > { %v2402_v33 = vadd.f32 %v3784_v58, %v2347_v32  ;;  %v2508_v39 = vrot.slane %v2401_v26, 7  ;;  %v1028_v40 = vadd.f32 %v934_v29, %v3588_v14  ;;  %v1029_v57 = vadd.f32 %v936_v3, %v799_v46 }
 0x1ee   : > { %v2511_v48 = vrot.slane %v2403_v4, 7  ;;  %v4225_v28 = vsel %vm916_vm2, %v5043_v15, %v5042_v7  ;;  %v1030_v25 = vadd.f32 %v935_v2, %v800_v61  ;;  %v1074_v58 = vmul.f32 %v3584_v12, %v3733_v21 }
 0x1ef   : > { %5054 = vst [vmem:[#allocation11_spill] sm:$0xff] %v4225_v28  ;;  %v2509_v17 = vrot.slane %v2402_v33, 7  ;;  %v1147_v13 = vrot.slane %v1073_v10, 2  ;;  %v1299_v29 = vmul.f32 %v3591_v19, %v3758_v34  ;;  %v1300_v32 = vmul.f32 %v3591_v19, %v3772_v47 }
 0x1f0   : > { %v1383_v26 = vmul.f32 %v3622_v36, %v3758_v34  ;;  %v1384_v4 = vmul.f32 %v3622_v36, %v3772_v47  ;;  %v1148_v2 = vrot.slane %v1074_v58, 2  ;;  %v1596_v7 = vmul.f32 %v3601_v24, %v3758_v34 }
 0x1f1   : > { %v2510_v46 = vsel %vm2482_vm4, %v2508_v39, %v2509_v17  ;;  %v2512_v61 = vsel %vm2482_vm4, %v2509_v17, %v2511_v48  ;;  %v1252_v33 = vadd.f32 %v1147_v13, %v1028_v40  ;;  %v1597_v39 = vmul.f32 %v3601_v24, %v3772_v47 }
 0x1f2   : > { %v2600_v21 = vpack.c.bf16 %v2512_v61, %v2510_v46  ;;  %v1453_v10 = vrot.slane %v1383_v26, 1  ;;  %v1454_v3 = vrot.slane %v1384_v4, 1  ;;  %v1149_v15 = vsel %vm1124_vm3, %v1147_v13, %v1148_v2 }
 0x1f3   : > { %v1150_v50 = vsel %vm1124_vm3, %v1148_v2, %v3593_v20  ;;  %v1337_v59 = vadd.f32 %v3610_v31, %v1252_v33  ;;  %v1253_v48 = vadd.f32 %v1149_v15, %v1029_v57  ;;  %v1674_v58 = vrot.slane %v1596_v7, 2 }
 0x1f4   : > { %3313 = vmatmul.mubr.msk.bf16.gmra.mrb[8].mxu1 %vm458_vm1, %v2600_v21  ;;  %v1254_v40 = vadd.f32 %v1150_v50, %v1030_v25  ;;  %v1455_v17 = vsel %vm916_vm2, %v1453_v10, %v1454_v3  ;;  %v1675_v4 = vrot.slane %v1597_v39, 2  ;;  %v1827_v13 = vmul.f32 %v3627_v42, %v3755_v63 }
 0x1f5   : > { %v1549_v26 = vadd.f32 %v1453_v10, %v1337_v59  ;;  %v1828_v46 = vmul.f32 %v3627_v42, %v3766_v55  ;;  %v1338_v61 = vadd.f32 %v1299_v29, %v1253_v48  ;;  %v1909_v33 = vmul.f32 %v3629_v43, %v3755_v63 }
 0x1f6   : > { %v1339_v2 = vadd.f32 %v1300_v32, %v1254_v40  ;;  %v1910_v15 = vmul.f32 %v3629_v43, %v3766_v55  ;;  %v1676_v50 = vsel %vm1124_vm3, %v1674_v58, %v1675_v4  ;;  %v1677_v7 = vsel %vm1124_vm3, %v1675_v4, %v3640_v49  ;;  %v5055_v40 = vld [vmem:[#allocation9_spill] sm:$0xff] }
 0x1f7   : > { %v1780_v59 = vadd.f32 %v1674_v58, %v1549_v26  ;;  %v2118_v57 = vmul.f32 %v4150_v38, %v3755_v63  ;;  %v1550_v25 = vadd.f32 %v1455_v17, %v1338_v61  ;;  %v1977_v10 = vrot.slane %v1909_v33, 1 }
 0x1f8   : > { %v1551_v21 = vadd.f32 %v1454_v3, %v1339_v2  ;;  %v1978_v29 = vrot.slane %v1910_v15, 1  ;;  %v2119_v39 = vmul.f32 %v4150_v38, %v3766_v55  ;;  %v708_v22 = vmul.f32 %v4163_v6, %v5055_v40  ;;  %v4300_v40 = vld [vmem:[%s5030_s6] ss:$0 sm:$0xff] }
 0x1f9   : > { %v1863_v32 = vadd.f32 %v3646_v52, %v1780_v59  ;;  %v2192_v48 = vrot.slane %v2118_v57, 2  ;;  %v1781_v28 = vadd.f32 %v1676_v50, %v1550_v25  ;;  %v801_v26 = vmul.f32 %v3582_v11, %v3758_v34 }
 0x1fa   : > { %v1782_v8 = vadd.f32 %v1677_v7, %v1551_v21  ;;  %v1979_v58 = vsel %vm916_vm2, %v1977_v10, %v1978_v29  ;;  %v2193_v3 = vrot.slane %v2119_v39, 2  ;;  %v747_v4 = vadd.f32 %v4178_v62, %v708_v22 }
 0x1fb   : > { %v2071_v17 = vadd.f32 %v1977_v10, %v1863_v32  ;;  %v802_v61 = vmul.f32 %v3582_v11, %v3772_v47  ;;  %v1864_v2 = vadd.f32 %v1827_v13, %v1781_v28  ;;  %v867_v15 = vmul.f32 %v3580_v9, %v3758_v34 }
 0x1fc   : > { %v1865_v33 = vadd.f32 %v1828_v46, %v1782_v8  ;;  %v868_v6 = vmul.f32 %v3580_v9, %v3772_v47  ;;  %v2194_v50 = vsel %vm1124_vm3, %v2192_v48, %v2193_v3  ;;  %v2195_v7 = vsel %vm1124_vm3, %v2193_v3, %v3648_v53  ;;  %v4286_v8 = vld [vmem:[%s5029_s5] ss:$0 sm:$0xff] }
 0x1fd   : > { %v2294_v59 = vadd.f32 %v2192_v48, %v2071_v17  ;;  %v4281_v57 = vmax.f32 %v747_v4, 0.0  ;;  %v2072_v62 = vadd.f32 %v1979_v58, %v1864_v2  ;;  %v937_v25 = vrot.slane %v867_v15, 1 }
 0x1fe   : > { %v2073_v22 = vadd.f32 %v1978_v29, %v1865_v33  ;;  %v938_v21 = vrot.slane %v868_v6, 1  ;;  %v1075_v13 = vmul.f32 %v3584_v12, %v3758_v34  ;;  %v1076_v46 = vmul.f32 %v3584_v12, %v3772_v47 }
 0x1ff   : > { %v2349_v28 = vmul.f32 %v4286_v8, %v2294_v59  ;;  %v1301_v10 = vmul.f32 %v3591_v19, %v3755_v63  ;;  %v2295_v32 = vadd.f32 %v2194_v50, %v2072_v62  ;;  %v1031_v48 = vadd.f32 %v937_v25, %v3588_v14 }
 0x200   : > { %v2296_v29 = vadd.f32 %v2195_v7, %v2073_v22  ;;  %v939_v39 = vsel %vm916_vm2, %v937_v25, %v938_v21  ;;  %v1033_v17 = vadd.f32 %v938_v21, %v802_v61  ;;  %v1151_v3 = vrot.slane %v1075_v13, 2 }
 0x201   : > { %v2404_v58 = vadd.f32 %v4300_v40, %v2349_v28  ;;  %v1032_v34 = vadd.f32 %v939_v39, %v801_v26  ;;  %v2350_v47 = vmul.f32 %v4286_v8, %v2295_v32  ;;  %v1152_v2 = vrot.slane %v1076_v46, 2 }
 0x202   : > { %v2351_v4 = vmul.f32 %v4286_v8, %v2296_v29  ;;  %v1302_v33 = vmul.f32 %v3591_v19, %v3766_v55  ;;  %v1255_v6 = vadd.f32 %v1151_v3, %v1031_v48  ;;  %v1385_v50 = vmul.f32 %v3622_v36, %v3755_v63 }
 0x203   : > { %v2513_v15 = vrot.slane %v2404_v58, 7  ;;  %v1386_v7 = vmul.f32 %v3622_v36, %v3766_v55  ;;  %v2405_v26 = vadd.f32 %v4300_v40, %v2350_v47  ;;  %v1153_v59 = vsel %vm1124_vm3, %v1151_v3, %v1152_v2 }
 0x204   : > { %v2406_v61 = vadd.f32 %v4300_v40, %v2351_v4  ;;  %v1154_v62 = vsel %vm1124_vm3, %v1152_v2, %v3593_v20  ;;  %v1256_v22 = vadd.f32 %v1153_v59, %v1032_v34  ;;  %v1340_v21 = vadd.f32 %v3610_v31, %v1255_v6 }
 0x205   : > { %v1257_v25 = vadd.f32 %v1154_v62, %v1033_v17  ;;  %v1456_v28 = vrot.slane %v1385_v50, 1  ;;  %v2514_v13 = vrot.slane %v2405_v26, 7  ;;  %v1457_v32 = vrot.slane %v1386_v7, 1 }
 0x206   : > { %v2516_v46 = vrot.slane %v2406_v61, 7  ;;  %v1598_v29 = vmul.f32 %v3601_v24, %v3755_v63  ;;  %v1341_v39 = vadd.f32 %v1301_v10, %v1256_v22  ;;  %v1599_v3 = vmul.f32 %v3601_v24, %v3766_v55  ;;  %v5056_v61 = vld [vmem:[#allocation3_spill] sm:$0xff] }
 0x207   : > { %v1342_v48 = vadd.f32 %v1302_v33, %v1257_v25  ;;  %v1552_v58 = vadd.f32 %v1456_v28, %v1340_v21  ;;  %v2515_v47 = vsel %vm2482_vm4, %v2513_v15, %v2514_v13  ;;  %v1458_v17 = vsel %vm916_vm2, %v1456_v28, %v1457_v32  ;;  %v5057_v33 = vld [vmem:[#allocation5_spill] sm:$0xff] }
 0x208   : > { %v2517_v34 = vsel %vm2482_vm4, %v2514_v13, %v2516_v46  ;;  %v1678_v4 = vrot.slane %v1598_v29, 2  ;;  %v1553_v6 = vadd.f32 %v1458_v17, %v1341_v39  ;;  %v1679_v7 = vrot.slane %v1599_v3, 2 }
 0x209   : > { %v2601_v2 = vpack.c.bf16 %v2517_v34, %v2515_v47  ;;  %v1554_v50 = vadd.f32 %v1457_v32, %v1342_v48  ;;  %v1829_v10 = vmul.f32 %v3627_v42, %v5056_v61  ;;  %v1830_v59 = vmul.f32 %v3627_v42, %v5057_v33 }
 0x20a   : > { %v1783_v26 = vadd.f32 %v1678_v4, %v1552_v58  ;;  %v1911_v62 = vmul.f32 %v3629_v43, %v5056_v61  ;;  %v1680_v15 = vsel %vm1124_vm3, %v1678_v4, %v1679_v7  ;;  %v1681_v22 = vsel %vm1124_vm3, %v1679_v7, %v3640_v49 }
 0x20b   : > { %3316 = vmatprep.mubr.msk.bf16.mxu1 %vm458_vm1, %v2601_v2  ;;  %v1912_v25 = vmul.f32 %v3629_v43, %v5057_v33  ;;  %v2120_v21 = vmul.f32 %v4150_v38, %v5056_v61  ;;  %v1784_v28 = vadd.f32 %v1680_v15, %v1553_v6  ;;  %v1785_v13 = vadd.f32 %v1681_v22, %v1554_v50 }
 0x20c   : > { %v1866_v46 = vadd.f32 %v3646_v52, %v1783_v26  ;;  %v1980_v32 = vrot.slane %v1911_v62, 1  ;;  %v2121_v39 = vmul.f32 %v4150_v38, %v5057_v33  ;;  %v803_v58 = vmul.f32 %v3582_v11, %v3755_v63 }
 0x20d   : > { %v1981_v29 = vrot.slane %v1912_v25, 1  ;;  %v2196_v48 = vrot.slane %v2120_v21, 2  ;;  %v1867_v3 = vadd.f32 %v1829_v10, %v1784_v28  ;;  %v1868_v47 = vadd.f32 %v1830_v59, %v1785_v13 }
 0x20e   : > { %v2074_v34 = vadd.f32 %v1980_v32, %v1866_v46  ;;  %v804_v17 = vmul.f32 %v3582_v11, %v3766_v55  ;;  %v2197_v2 = vrot.slane %v2121_v39, 2  ;;  %v869_v6 = vmul.f32 %v3580_v9, %v3755_v63 }
 0x20f   : > { %v1982_v4 = vsel %vm916_vm2, %v1980_v32, %v1981_v29  ;;  %v870_v50 = vmul.f32 %v3580_v9, %v3766_v55  ;;  %v2076_v26 = vadd.f32 %v1981_v29, %v1868_v47  ;;  %v1077_v10 = vmul.f32 %v3584_v12, %v3755_v63 }
 0x210   : > { %v2075_v7 = vadd.f32 %v1982_v4, %v1867_v3  ;;  %v2297_v62 = vadd.f32 %v2196_v48, %v2074_v34  ;;  %v2198_v59 = vsel %vm1124_vm3, %v2196_v48, %v2197_v2  ;;  %v2199_v15 = vsel %vm1124_vm3, %v2197_v2, %v3648_v53 }
 0x211   : > { %v940_v22 = vrot.slane %v869_v6, 1  ;;  %v941_v25 = vrot.slane %v870_v50, 1  ;;  %v2299_v28 = vadd.f32 %v2199_v15, %v2076_v26  ;;  %v1078_v46 = vmul.f32 %v3584_v12, %v3766_v55 }
 0x212   : > { %v2298_v21 = vadd.f32 %v2198_v59, %v2075_v7  ;;  %v2352_v13 = vmul.f32 %v4286_v8, %v2297_v62  ;;  %v1155_v63 = vrot.slane %v1077_v10, 2  ;;  %v1303_v6 = vmul.f32 %v3591_v19, %v5056_v61 }
 0x213   : > { %v942_v32 = vsel %vm916_vm2, %v940_v22, %v941_v25  ;;  %v1034_v29 = vadd.f32 %v940_v22, %v3588_v14  ;;  %v1036_v39 = vadd.f32 %v941_v25, %v804_v17  ;;  %v2354_v3 = vmul.f32 %v4286_v8, %v2299_v28 }
 0x214   : > { %v2353_v48 = vmul.f32 %v4286_v8, %v2298_v21  ;;  %v2407_v47 = vadd.f32 %v4300_v40, %v2352_v13  ;;  %v1035_v34 = vadd.f32 %v942_v32, %v803_v58  ;;  %v1156_v4 = vrot.slane %v1078_v46, 2 }
 0x215   : > { %v1258_v2 = vadd.f32 %v1155_v63, %v1034_v29  ;;  %v1304_v55 = vmul.f32 %v3591_v19, %v5057_v33  ;;  %v2409_v17 = vadd.f32 %v4300_v40, %v2354_v3  ;;  %v1387_v26 = vmul.f32 %v3622_v36, %v5056_v61 }
 0x216   : > { %v2408_v50 = vadd.f32 %v4300_v40, %v2353_v48  ;;  %v2518_v7 = vrot.slane %v2407_v47, 7  ;;  %v1157_v62 = vsel %vm1124_vm3, %v1155_v63, %v1156_v4  ;;  %v1158_v58 = vsel %vm1124_vm3, %v1156_v4, %v3593_v20 }
 0x217   : > { %v1343_v10 = vadd.f32 %v3610_v31, %v1258_v2  ;;  %v1388_v59 = vmul.f32 %v3622_v36, %v5057_v33  ;;  %v2521_v22 = vrot.slane %v2409_v17, 7  ;;  %v1259_v25 = vadd.f32 %v1157_v62, %v1035_v34 }
 0x218   : > { %v2519_v15 = vrot.slane %v2408_v50, 7  ;;  %v1260_v21 = vadd.f32 %v1158_v58, %v1036_v39  ;;  %v1459_v28 = vrot.slane %v1387_v26, 1  ;;  %v1600_v46 = vmul.f32 %v3601_v24, %v5056_v61  ;;  %v5058_v26 = vld [vmem:[#allocation2_spill] sm:$0xff] }
 0x219   : > { %v1460_v13 = vrot.slane %v1388_v59, 1  ;;  %v1601_v32 = vmul.f32 %v3601_v24, %v5057_v33  ;;  %v1344_v48 = vadd.f32 %v1303_v6, %v1259_v25  ;;  %v1831_v62 = vmul.f32 %v3627_v42, %v5058_v26  ;;  %v5059_v59 = vld [vmem:[#allocation4_spill] sm:$0xff] }
 0x21a   : > { %v2520_v29 = vsel %vm2482_vm4, %v2518_v7, %v2519_v15  ;;  %v2522_v63 = vsel %vm2482_vm4, %v2519_v15, %v2521_v22  ;;  %v1345_v3 = vadd.f32 %v1304_v55, %v1260_v21  ;;  %v1555_v2 = vadd.f32 %v1459_v28, %v1343_v10 }
 0x21b   : > { %v2602_v47 = vpack.c.bf16 %v2522_v63, %v2520_v29  ;;  %v1461_v4 = vsel %vm916_vm2, %v1459_v28, %v1460_v13  ;;  %v1682_v34 = vrot.slane %v1600_v46, 2  ;;  %v1683_v17 = vrot.slane %v1601_v32, 2 }
 0x21c   : > { %v1556_v39 = vadd.f32 %v1461_v4, %v1344_v48  ;;  %v1557_v50 = vadd.f32 %v1460_v13, %v1345_v3  ;;  %v1832_v7 = vmul.f32 %v3627_v42, %v5059_v59  ;;  %v1913_v6 = vmul.f32 %v3629_v43, %v5058_v26 }
 0x21d   : > { %3317 = vmatmul.mubr.msk.bf16.gmra.mrb[12].mxu1 %vm458_vm1, %v2602_v47  ;;  %v1786_v58 = vadd.f32 %v1682_v34, %v1555_v2  ;;  %v1914_v55 = vmul.f32 %v3629_v43, %v5059_v59  ;;  %v1684_v10 = vsel %vm1124_vm3, %v1682_v34, %v1683_v17  ;;  %v1685_v15 = vsel %vm1124_vm3, %v1683_v17, %v3640_v49 }
 0x21e   : > { %v2122_v22 = vmul.f32 %v4150_v38, %v5058_v26  ;;  %v2123_v25 = vmul.f32 %v4150_v38, %v5059_v59  ;;  %v1787_v21 = vadd.f32 %v1684_v10, %v1556_v39  ;;  %v1788_v28 = vadd.f32 %v1685_v15, %v1557_v50 }
 0x21f   : > { %v1869_v13 = vadd.f32 %v3646_v52, %v1786_v58  ;;  %v1983_v46 = vrot.slane %v1913_v6, 1  ;;  %v1984_v32 = vrot.slane %v1914_v55, 1  ;;  %v805_v48 = vmul.f32 %v3582_v11, %v5056_v61 }
 0x220   : > { %v2200_v29 = vrot.slane %v2122_v22, 2  ;;  %v2201_v63 = vrot.slane %v2123_v25, 2  ;;  %v1870_v3 = vadd.f32 %v1831_v62, %v1787_v21  ;;  %v1871_v47 = vadd.f32 %v1832_v7, %v1788_v28 }
 0x221   : > { %v2077_v4 = vadd.f32 %v1983_v46, %v1869_v13  ;;  %v806_v2 = vmul.f32 %v3582_v11, %v5057_v33  ;;  %v1985_v34 = vsel %vm916_vm2, %v1983_v46, %v1984_v32  ;;  %v871_v17 = vmul.f32 %v3580_v9, %v5056_v61 }
 0x222   : > { %v2202_v39 = vsel %vm1124_vm3, %v2200_v29, %v2201_v63  ;;  %v2203_v50 = vsel %vm1124_vm3, %v2201_v63, %v3648_v53  ;;  %v2078_v58 = vadd.f32 %v1985_v34, %v1870_v3  ;;  %v2079_v6 = vadd.f32 %v1984_v32, %v1871_v47 }
 0x223   : > { %v2300_v55 = vadd.f32 %v2200_v29, %v2077_v4  ;;  %v872_v62 = vmul.f32 %v3580_v9, %v5057_v33  ;;  %v943_v7 = vrot.slane %v871_v17, 1  ;;  %v1079_v10 = vmul.f32 %v3584_v12, %v5056_v61 }
 0x224   : > { %v1080_v15 = vmul.f32 %v3584_v12, %v5057_v33  ;;  %v1305_v22 = vmul.f32 %v3591_v19, %v5058_v26  ;;  %v2301_v25 = vadd.f32 %v2202_v39, %v2078_v58  ;;  %v2302_v21 = vadd.f32 %v2203_v50, %v2079_v6 }
 0x225   : > { %v2355_v28 = vmul.f32 %v4286_v8, %v2300_v55  ;;  %v944_v13 = vrot.slane %v872_v62, 1  ;;  %v1037_v46 = vadd.f32 %v943_v7, %v3588_v14  ;;  %v1159_v32 = vrot.slane %v1079_v10, 2 }
 0x226   : > { %v1160_v29 = vrot.slane %v1080_v15, 2  ;;  %v1306_v63 = vmul.f32 %v3591_v19, %v5059_v59  ;;  %v2356_v61 = vmul.f32 %v4286_v8, %v2301_v25  ;;  %v2357_v3 = vmul.f32 %v4286_v8, %v2302_v21 }
 0x227   : > { %v2410_v33 = vadd.f32 %v4300_v40, %v2355_v28  ;;  %v945_v47 = vsel %vm916_vm2, %v943_v7, %v944_v13  ;;  %v1039_v34 = vadd.f32 %v944_v13, %v806_v2  ;;  %v1261_v55 = vadd.f32 %v1159_v32, %v1037_v46 }
 0x228   : > { %v1038_v4 = vadd.f32 %v945_v47, %v805_v48  ;;  %v1161_v39 = vsel %vm1124_vm3, %v1159_v32, %v1160_v29  ;;  %v1162_v50 = vsel %vm1124_vm3, %v1160_v29, %v3593_v20  ;;  %v2411_v17 = vadd.f32 %v4300_v40, %v2356_v61 }
 0x229   : > { %v2412_v58 = vadd.f32 %v4300_v40, %v2357_v3  ;;  %v2523_v6 = vrot.slane %v2410_v33, 7  ;;  %v1263_v10 = vadd.f32 %v1162_v50, %v1039_v34  ;;  %v1389_v15 = vmul.f32 %v3622_v36, %v5058_v26 }
 0x22a   : > { %v1262_v62 = vadd.f32 %v1161_v39, %v1038_v4  ;;  %v1390_v48 = vmul.f32 %v3622_v36, %v5059_v59  ;;  %v2524_v2 = vrot.slane %v2411_v17, 7  ;;  %v1346_v25 = vadd.f32 %v3610_v31, %v1261_v55 }
 0x22b   : > { %v2526_v7 = vrot.slane %v2412_v58, 7  ;;  %v1602_v21 = vmul.f32 %v3601_v24, %v5058_v26  ;;  %v1348_v13 = vadd.f32 %v1306_v63, %v1263_v10  ;;  %v1462_v29 = vrot.slane %v1389_v15, 1  ;;  %v5060_v58 = vld [vmem:[#allocation7_spill] sm:$0xff] }
 0x22c   : > { %v1347_v28 = vadd.f32 %v1305_v22, %v1262_v62  ;;  %v1463_v61 = vrot.slane %v1390_v48, 1  ;;  %v2525_v46 = vsel %vm2482_vm4, %v2523_v6, %v2524_v2  ;;  %v1603_v3 = vmul.f32 %v3601_v24, %v5059_v59 }
 0x22d   : > { %v2527_v32 = vsel %vm2482_vm4, %v2524_v2, %v2526_v7  ;;  %v1686_v33 = vrot.slane %v1602_v21, 2  ;;  %v1558_v34 = vadd.f32 %v1462_v29, %v1346_v25  ;;  %v1833_v22 = vmul.f32 %v3627_v42, %v5060_v58 }
 0x22e   : > { %v2603_v47 = vpack.c.bf16 %v2527_v32, %v2525_v46  ;;  %v1464_v4 = vsel %vm916_vm2, %v1462_v29, %v1463_v61  ;;  %v1560_v39 = vadd.f32 %v1463_v61, %v1348_v13  ;;  %v1687_v17 = vrot.slane %v1603_v3, 2 }
 0x22f   : > { %v1559_v50 = vadd.f32 %v1464_v4, %v1347_v28  ;;  %v1834_v63 = vmul.f32 %v3627_v42, %v3932_v45  ;;  %v1789_v6 = vadd.f32 %v1686_v33, %v1558_v34  ;;  %v1915_v55 = vmul.f32 %v3629_v43, %v5060_v58 }
 0x230   : > { %3320 = vmatprep.mubr.msk.bf16.mxu1 %vm458_vm1, %v2603_v47  ;;  %v1916_v62 = vmul.f32 %v3629_v43, %v3932_v45  ;;  %v2124_v10 = vmul.f32 %v4150_v38, %v5060_v58  ;;  %v1688_v15 = vsel %vm1124_vm3, %v1686_v33, %v1687_v17  ;;  %v1689_v48 = vsel %vm1124_vm3, %v1687_v17, %v3640_v49 }
 0x231   : > { %v2125_v2 = vmul.f32 %v4150_v38, %v3932_v45  ;;  %v807_v7 = vmul.f32 %v3582_v11, %v5058_v26  ;;  %v1790_v25 = vadd.f32 %v1688_v15, %v1559_v50  ;;  %v1791_v21 = vadd.f32 %v1689_v48, %v1560_v39 }
 0x232   : > { %v1872_v28 = vadd.f32 %v3646_v52, %v1789_v6  ;;  %v1986_v13 = vrot.slane %v1915_v55, 1  ;;  %v1987_v29 = vrot.slane %v1916_v62, 1  ;;  %v2204_v61 = vrot.slane %v2124_v10, 2 }
 0x233   : > { %v2205_v46 = vrot.slane %v2125_v2, 2  ;;  %v808_v32 = vmul.f32 %v3582_v11, %v5059_v59  ;;  %v1873_v3 = vadd.f32 %v1833_v22, %v1790_v25  ;;  %v1874_v33 = vadd.f32 %v1834_v63, %v1791_v21 }
 0x234   : > { %v2080_v47 = vadd.f32 %v1986_v13, %v1872_v28  ;;  %v873_v4 = vmul.f32 %v3580_v9, %v5058_v26  ;;  %v1988_v34 = vsel %vm916_vm2, %v1986_v13, %v1987_v29  ;;  %v874_v17 = vmul.f32 %v3580_v9, %v5059_v59 }
 0x235   : > { %v2206_v50 = vsel %vm1124_vm3, %v2204_v61, %v2205_v46  ;;  %v2207_v39 = vsel %vm1124_vm3, %v2205_v46, %v3648_v53  ;;  %v2081_v6 = vadd.f32 %v1988_v34, %v1873_v3  ;;  %v2082_v55 = vadd.f32 %v1987_v29, %v1874_v33 }
 0x236   : > { %v2303_v62 = vadd.f32 %v2204_v61, %v2080_v47  ;;  %v946_v10 = vrot.slane %v873_v4, 1  ;;  %v947_v22 = vrot.slane %v874_v17, 1  ;;  %v1081_v63 = vmul.f32 %v3584_v12, %v5058_v26 }
 0x237   : > { %v1082_v15 = vmul.f32 %v3584_v12, %v5059_v59  ;;  %v1307_v48 = vmul.f32 %v3591_v19, %v5060_v58  ;;  %v2304_v2 = vadd.f32 %v2206_v50, %v2081_v6  ;;  %v2305_v25 = vadd.f32 %v2207_v39, %v2082_v55 }
 0x238   : > { %v2358_v21 = vmul.f32 %v4286_v8, %v2303_v62  ;;  %v1040_v28 = vadd.f32 %v946_v10, %v3588_v14  ;;  %v948_v13 = vsel %vm916_vm2, %v946_v10, %v947_v22  ;;  %v1042_v29 = vadd.f32 %v947_v22, %v808_v32 }
 0x239   : > { %v1163_v61 = vrot.slane %v1081_v63, 2  ;;  %v1164_v46 = vrot.slane %v1082_v15, 2  ;;  %v2359_v3 = vmul.f32 %v4286_v8, %v2304_v2  ;;  %v2360_v26 = vmul.f32 %v4286_v8, %v2305_v25 }
 0x23a   : > { %v2413_v59 = vadd.f32 %v4300_v40, %v2358_v21  ;;  %v1041_v33 = vadd.f32 %v948_v13, %v807_v7  ;;  %v1308_v50 = vmul.f32 %v3591_v19, %v3932_v45  ;;  %v1391_v7 = vmul.f32 %v3622_v36, %v5060_v58 }
 0x23b   : > { %v1165_v47 = vsel %vm1124_vm3, %v1163_v61, %v1164_v46  ;;  %v1166_v4 = vsel %vm1124_vm3, %v1164_v46, %v3593_v20  ;;  %v1264_v34 = vadd.f32 %v1163_v61, %v1040_v28  ;;  %v2414_v32 = vadd.f32 %v4300_v40, %v2359_v3  ;;  %v5061_v3 = vld [vmem:[#allocation6_spill] sm:$0xff] }
 0x23c   : > { %v2415_v39 = vadd.f32 %v4300_v40, %v2360_v26  ;;  %v2528_v17 = vrot.slane %v2413_v59, 7  ;;  %v1265_v6 = vadd.f32 %v1165_v47, %v1041_v33  ;;  %v1266_v55 = vadd.f32 %v1166_v4, %v1042_v29 }
 0x23d   : > { %v1349_v62 = vadd.f32 %v3610_v31, %v1264_v34  ;;  %v1392_v10 = vmul.f32 %v3622_v36, %v3932_v45  ;;  %v2529_v22 = vrot.slane %v2414_v32, 7  ;;  %v1604_v2 = vmul.f32 %v3601_v24, %v5060_v58 }
 0x23e   : > { %v2531_v63 = vrot.slane %v2415_v39, 7  ;;  %v1350_v15 = vadd.f32 %v1307_v48, %v1265_v6  ;;  %v1351_v25 = vadd.f32 %v1308_v50, %v1266_v55  ;;  %v1465_v21 = vrot.slane %v1391_v7, 1  ;;  %v5062_v50 = vld [vmem:[#allocation8_spill] sm:$0xff] }
 0x23f   : > { %v1466_v28 = vrot.slane %v1392_v10, 1  ;;  %v1605_v13 = vmul.f32 %v3601_v24, %v3932_v45  ;;  %v2530_v29 = vsel %vm2482_vm4, %v2528_v17, %v2529_v22  ;;  %v1690_v46 = vrot.slane %v1604_v2, 2 }
 0x240   : > { %v2532_v61 = vsel %vm2482_vm4, %v2529_v22, %v2531_v63  ;;  %v1835_v26 = vmul.f32 %v3627_v42, %v5061_v3  ;;  %v1561_v33 = vadd.f32 %v1465_v21, %v1349_v62  ;;  %v1836_v32 = vmul.f32 %v3627_v42, %v5062_v50 }
 0x241   : > { %v2604_v59 = vpack.c.bf16 %v2532_v61, %v2530_v29  ;;  %v1467_v48 = vsel %vm916_vm2, %v1465_v21, %v1466_v28  ;;  %v1563_v47 = vadd.f32 %v1466_v28, %v1351_v25  ;;  %v1691_v34 = vrot.slane %v1605_v13, 2 }
 0x242   : > { %v1562_v4 = vadd.f32 %v1467_v48, %v1350_v15  ;;  %v1917_v39 = vmul.f32 %v3629_v43, %v5061_v3  ;;  %v1792_v17 = vadd.f32 %v1690_v46, %v1561_v33  ;;  %v1918_v6 = vmul.f32 %v3629_v43, %v5062_v50 }
 0x243   : > { %3321 = vmatmul.mubr.msk.bf16.gmra.mrb[16].mxu1 %vm458_vm1, %v2604_v59  ;;  %v2126_v55 = vmul.f32 %v4150_v38, %v5061_v3  ;;  %v2127_v62 = vmul.f32 %v4150_v38, %v5062_v50  ;;  %v1692_v7 = vsel %vm1124_vm3, %v1690_v46, %v1691_v34  ;;  %v1693_v10 = vsel %vm1124_vm3, %v1691_v34, %v3640_v49 }
 0x244   : > { %v1989_v22 = vrot.slane %v1917_v39, 1  ;;  %v809_v63 = vmul.f32 %v3582_v11, %v5060_v58  ;;  %v1793_v15 = vadd.f32 %v1692_v7, %v1562_v4  ;;  %v1794_v2 = vadd.f32 %v1693_v10, %v1563_v47 }
 0x245   : > { %v1875_v25 = vadd.f32 %v3646_v52, %v1792_v17  ;;  %v1990_v21 = vrot.slane %v1918_v6, 1  ;;  %v2208_v28 = vrot.slane %v2126_v55, 2  ;;  %v2209_v13 = vrot.slane %v2127_v62, 2 }
 0x246   : > { %v810_v29 = vmul.f32 %v3582_v11, %v3932_v45  ;;  %v875_v61 = vmul.f32 %v3580_v9, %v5060_v58  ;;  %v1876_v46 = vadd.f32 %v1835_v26, %v1793_v15  ;;  %v1877_v59 = vadd.f32 %v1836_v32, %v1794_v2 }
 0x247   : > { %v1991_v48 = vsel %vm916_vm2, %v1989_v22, %v1990_v21  ;;  %v2083_v33 = vadd.f32 %v1989_v22, %v1875_v25  ;;  %v2210_v34 = vsel %vm1124_vm3, %v2208_v28, %v2209_v13  ;;  %v2211_v47 = vsel %vm1124_vm3, %v2209_v13, %v3648_v53 }
 0x248   : > { %v876_v4 = vmul.f32 %v3580_v9, %v3932_v45  ;;  %v949_v39 = vrot.slane %v875_v61, 1  ;;  %v2084_v17 = vadd.f32 %v1991_v48, %v1876_v46  ;;  %v2085_v6 = vadd.f32 %v1990_v21, %v1877_v59 }
 0x249   : > { %v2306_v55 = vadd.f32 %v2208_v28, %v2083_v33  ;;  %v1083_v62 = vmul.f32 %v3584_v12, %v5060_v58  ;;  %v1084_v7 = vmul.f32 %v3584_v12, %v3932_v45  ;;  %v1309_v10 = vmul.f32 %v3591_v19, %v5061_v3 }
 0x24a   : > { %v950_v26 = vrot.slane %v876_v4, 1  ;;  %v1043_v32 = vadd.f32 %v949_v39, %v3588_v14  ;;  %v2307_v22 = vadd.f32 %v2210_v34, %v2084_v17  ;;  %v2308_v15 = vadd.f32 %v2211_v47, %v2085_v6 }
 0x24b   : > { %v2361_v2 = vmul.f32 %v4286_v8, %v2306_v55  ;;  %v1167_v25 = vrot.slane %v1083_v62, 2  ;;  %v1168_v13 = vrot.slane %v1084_v7, 2  ;;  %v1310_v58 = vmul.f32 %v3591_v19, %v5062_v50 }
 0x24c   : > { %v951_v21 = vsel %vm916_vm2, %v949_v39, %v950_v26  ;;  %v1045_v28 = vadd.f32 %v950_v26, %v810_v29  ;;  %v2362_v61 = vmul.f32 %v4286_v8, %v2307_v22  ;;  %v2363_v46 = vmul.f32 %v4286_v8, %v2308_v15 }
 0x24d   : > { %v2416_v45 = vadd.f32 %v4300_v40, %v2361_v2  ;;  %v1044_v59 = vadd.f32 %v951_v21, %v809_v63  ;;  %v1169_v48 = vsel %vm1124_vm3, %v1167_v25, %v1168_v13  ;;  %v1170_v33 = vsel %vm1124_vm3, %v1168_v13, %v3593_v20 }
 0x24e   : > { %v1267_v34 = vadd.f32 %v1167_v25, %v1043_v32  ;;  %v1393_v29 = vmul.f32 %v3622_v36, %v5061_v3  ;;  %v2417_v47 = vadd.f32 %v4300_v40, %v2362_v61  ;;  %v2418_v4 = vadd.f32 %v4300_v40, %v2363_v46 }
 0x24f   : > { %v2533_v39 = vrot.slane %v2416_v45, 7  ;;  %v1268_v17 = vadd.f32 %v1169_v48, %v1044_v59  ;;  %v1269_v6 = vadd.f32 %v1170_v33, %v1045_v28  ;;  %v1394_v63 = vmul.f32 %v3622_v36, %v5062_v50 }
 0x250   : > { %v1352_v55 = vadd.f32 %v3610_v31, %v1267_v34  ;;  %v1468_v62 = vrot.slane %v1393_v29, 1  ;;  %v2534_v26 = vrot.slane %v2417_v47, 7  ;;  %v2536_v7 = vrot.slane %v2418_v4, 7 }
 0x251   : > { %v1353_v22 = vadd.f32 %v1309_v10, %v1268_v17  ;;  %v1606_v32 = vmul.f32 %v3601_v24, %v5061_v3  ;;  %v1354_v15 = vadd.f32 %v1310_v58, %v1269_v6  ;;  %v1469_v2 = vrot.slane %v1394_v63, 1 }
 0x252   : > { %v1564_v25 = vadd.f32 %v1468_v62, %v1352_v55  ;;  %v1607_v21 = vmul.f32 %v3601_v24, %v5062_v50  ;;  %v2535_v28 = vsel %vm2482_vm4, %v2533_v39, %v2534_v26  ;;  %v2537_v13 = vsel %vm2482_vm4, %v2534_v26, %v2536_v7 }
 0x253   : > { %v1694_v61 = vrot.slane %v1606_v32, 2  ;;  %v1837_v46 = vmul.f32 %v3627_v42, %v4007_v60  ;;  %v2605_v45 = vpack.c.bf16 %v2537_v13, %v2535_v28  ;;  %v1470_v10 = vsel %vm916_vm2, %v1468_v62, %v1469_v2 }
 0x254   : > { %v1566_v59 = vadd.f32 %v1469_v2, %v1354_v15  ;;  %v1695_v48 = vrot.slane %v1607_v21, 2  ;;  %v1565_v33 = vadd.f32 %v1470_v10, %v1353_v22  ;;  %v1838_v34 = vmul.f32 %v3627_v42, %v4072_v37 }
 0x255   : > { %v1795_v58 = vadd.f32 %v1694_v61, %v1564_v25  ;;  %v1919_v29 = vmul.f32 %v3629_v43, %v4007_v60  ;;  %3324 = vmatprep.mubr.msk.bf16.mxu1 %vm458_vm1, %v2605_v45  ;;  %v1920_v39 = vmul.f32 %v3629_v43, %v4072_v37  ;;  %v2128_v17 = vmul.f32 %v4150_v38, %v4007_v60 }
 0x256   : > { %v1696_v47 = vsel %vm1124_vm3, %v1694_v61, %v1695_v48  ;;  %v1697_v4 = vsel %vm1124_vm3, %v1695_v48, %v3640_v49  ;;  %v2129_v7 = vmul.f32 %v4150_v38, %v4072_v37  ;;  %v811_v32 = vmul.f32 %v3582_v11, %v5061_v3 }
 0x257   : > { %v1796_v6 = vadd.f32 %v1696_v47, %v1565_v33  ;;  %v1797_v55 = vadd.f32 %v1697_v4, %v1566_v59  ;;  %v1878_v63 = vadd.f32 %v3646_v52, %v1795_v58  ;;  %v1992_v62 = vrot.slane %v1919_v29, 1 }
 0x258   : > { %v1993_v26 = vrot.slane %v1920_v39, 1  ;;  %v2212_v22 = vrot.slane %v2128_v17, 2  ;;  %v812_v21 = vmul.f32 %v3582_v11, %v5062_v50  ;;  %v2213_v13 = vrot.slane %v2129_v7, 2 }
 0x259   : > { %v1879_v15 = vadd.f32 %v1837_v46, %v1796_v6  ;;  %v1880_v2 = vadd.f32 %v1838_v34, %v1797_v55  ;;  %v2086_v25 = vadd.f32 %v1992_v62, %v1878_v63  ;;  %v877_v61 = vmul.f32 %v3580_v9, %v5061_v3 }
 0x25a   : > { %v1994_v28 = vsel %vm916_vm2, %v1992_v62, %v1993_v26  ;;  %v878_v45 = vmul.f32 %v3580_v9, %v5062_v50  ;;  %v1085_v46 = vmul.f32 %v3584_v12, %v5061_v3  ;;  %v2214_v48 = vsel %vm1124_vm3, %v2212_v22, %v2213_v13 }
 0x25b   : > { %v2087_v38 = vadd.f32 %v1994_v28, %v1879_v15  ;;  %v2088_v10 = vadd.f32 %v1993_v26, %v1880_v2  ;;  %v2309_v59 = vadd.f32 %v2212_v22, %v2086_v25  ;;  %v2215_v33 = vsel %vm1124_vm3, %v2213_v13, %v3648_v53 }
 0x25c   : > { %v952_v58 = vrot.slane %v877_v61, 1  ;;  %v953_v34 = vrot.slane %v878_v45, 1  ;;  %v1086_v39 = vmul.f32 %v3584_v12, %v5062_v50  ;;  %v1171_v3 = vrot.slane %v1085_v46, 2 }
 0x25d   : > { %v2310_v29 = vadd.f32 %v2214_v48, %v2087_v38  ;;  %v2311_v47 = vadd.f32 %v2215_v33, %v2088_v10  ;;  %v2364_v4 = vmul.f32 %v4286_v8, %v2309_v59  ;;  %v1311_v2 = vmul.f32 %v3591_v19, %v4007_v60 }
 0x25e   : > { %v954_v17 = vsel %vm916_vm2, %v952_v58, %v953_v34  ;;  %v1046_v6 = vadd.f32 %v952_v58, %v3588_v14  ;;  %v1048_v55 = vadd.f32 %v953_v34, %v812_v21  ;;  %v1172_v22 = vrot.slane %v1086_v39, 2 }
 0x25f   : > { %v2365_v63 = vmul.f32 %v4286_v8, %v2310_v29  ;;  %v2366_v62 = vmul.f32 %v4286_v8, %v2311_v47  ;;  %v2419_v26 = vadd.f32 %v4300_v40, %v2364_v4  ;;  %v1047_v7 = vadd.f32 %v954_v17, %v811_v32 }
 0x260   : > { %v1270_v15 = vadd.f32 %v1171_v3, %v1046_v6  ;;  %v1312_v50 = vmul.f32 %v3591_v19, %v4072_v37  ;;  %v1395_v13 = vmul.f32 %v3622_v36, %v4007_v60  ;;  %v1173_v61 = vsel %vm1124_vm3, %v1171_v3, %v1172_v22 }
 0x261   : > { %v2420_v25 = vadd.f32 %v4300_v40, %v2365_v63  ;;  %v2421_v21 = vadd.f32 %v4300_v40, %v2366_v62  ;;  %v2538_v28 = vrot.slane %v2419_v26, 7  ;;  %v1174_v32 = vsel %vm1124_vm3, %v1172_v22, %v3593_v20 }
 0x262   : > { %v1355_v45 = vadd.f32 %v3610_v31, %v1270_v15  ;;  %v1396_v38 = vmul.f32 %v3622_v36, %v4072_v37  ;;  %v1271_v46 = vadd.f32 %v1173_v61, %v1047_v7  ;;  %v1272_v48 = vadd.f32 %v1174_v32, %v1048_v55 }
 0x263   : > { %v2539_v10 = vrot.slane %v2420_v25, 7  ;;  %v2541_v59 = vrot.slane %v2421_v21, 7  ;;  %v1471_v33 = vrot.slane %v1395_v13, 1  ;;  %v1608_v34 = vmul.f32 %v3601_v24, %v4007_v60  ;;  %v4639_v13 = vld [vmem:[%s5028_s4 + $0x8] ss:$0 sm:$0xff] }
 0x264   : > { %v1472_v58 = vrot.slane %v1396_v38, 1  ;;  %v1609_v29 = vmul.f32 %v3601_v24, %v4072_v37  ;;  %v1356_v39 = vadd.f32 %v1311_v2, %v1271_v46  ;;  %v1357_v17 = vadd.f32 %v1312_v50, %v1272_v48 }
 0x265   : > { %v2540_v47 = vsel %vm2482_vm4, %v2538_v28, %v2539_v10  ;;  %v2542_v4 = vsel %vm2482_vm4, %v2539_v10, %v2541_v59  ;;  %v1567_v63 = vadd.f32 %v1471_v33, %v1355_v45  ;;  %v1698_v62 = vrot.slane %v1608_v34, 2 }
 0x266   : > { %v2606_v6 = vpack.c.bf16 %v2542_v4, %v2540_v47  ;;  %v1473_v3 = vsel %vm916_vm2, %v1471_v33, %v1472_v58  ;;  %v1569_v26 = vadd.f32 %v1472_v58, %v1357_v17  ;;  %v1699_v7 = vrot.slane %v1609_v29, 2 }
 0x267   : > { %v1568_v55 = vadd.f32 %v1473_v3, %v1356_v39  ;;  %v1839_v22 = vmul.f32 %v3627_v42, %v3937_v35  ;;  %v1798_v15 = vadd.f32 %v1698_v62, %v1567_v63  ;;  %v1840_v25 = vmul.f32 %v3627_v42, %v4013_v0 }
 0x268   : > { %3325 = vmatmul.mubr.msk.bf16.gmra.mrb[20].mxu1 %vm458_vm1, %v2606_v6  ;;  %v1921_v2 = vmul.f32 %v3629_v43, %v3937_v35  ;;  %v1922_v50 = vmul.f32 %v3629_v43, %v4013_v0  ;;  %v1700_v21 = vsel %vm1124_vm3, %v1698_v62, %v1699_v7  ;;  %v1701_v28 = vsel %vm1124_vm3, %v1699_v7, %v3640_v49 }
 0x269   : > { %v2130_v61 = vmul.f32 %v4639_v13, %v3937_v35  ;;  %v2131_v32 = vmul.f32 %v4639_v13, %v4013_v0  ;;  %v1799_v45 = vadd.f32 %v1700_v21, %v1568_v55  ;;  %v1800_v38 = vadd.f32 %v1701_v28, %v1569_v26 }
 0x26a   : > { %v1881_v10 = vadd.f32 %v3646_v52, %v1798_v15  ;;  %v1995_v59 = vrot.slane %v1921_v2, 1  ;;  %v1996_v46 = vrot.slane %v1922_v50, 1  ;;  %v813_v58 = vmul.f32 %v3582_v11, %v4007_v60 }
 0x26b   : > { %v2216_v48 = vrot.slane %v2130_v61, 2  ;;  %v2217_v33 = vrot.slane %v2131_v32, 2  ;;  %v1882_v34 = vadd.f32 %v1839_v22, %v1799_v45  ;;  %v1883_v29 = vadd.f32 %v1840_v25, %v1800_v38 }
 0x26c   : > { %v2089_v47 = vadd.f32 %v1995_v59, %v1881_v10  ;;  %v814_v4 = vmul.f32 %v3582_v11, %v4072_v37  ;;  %v1997_v39 = vsel %vm916_vm2, %v1995_v59, %v1996_v46  ;;  %v879_v3 = vmul.f32 %v3580_v9, %v4007_v60 }
 0x26d   : > { %v2218_v17 = vsel %vm1124_vm3, %v2216_v48, %v2217_v33  ;;  %v2219_v6 = vsel %vm1124_vm3, %v2217_v33, %v3648_v53  ;;  %v2090_v63 = vadd.f32 %v1997_v39, %v1882_v34  ;;  %v2091_v62 = vadd.f32 %v1996_v46, %v1883_v29 }
 0x26e   : > { %v2312_v55 = vadd.f32 %v2216_v48, %v2089_v47  ;;  %v880_v26 = vmul.f32 %v3580_v9, %v4072_v37  ;;  %v955_v7 = vrot.slane %v879_v3, 1  ;;  %v1087_v22 = vmul.f32 %v3584_v12, %v4007_v60 }
 0x26f   : > { %v1088_v15 = vmul.f32 %v3584_v12, %v4072_v37  ;;  %v1313_v25 = vmul.f32 %v3591_v19, %v3937_v35  ;;  %v2313_v2 = vadd.f32 %v2218_v17, %v2090_v63  ;;  %v2314_v50 = vadd.f32 %v2219_v6, %v2091_v62 }
 0x270   : > { %v2367_v21 = vmul.f32 %v4286_v8, %v2312_v55  ;;  %v956_v28 = vrot.slane %v880_v26, 1  ;;  %v1049_v61 = vadd.f32 %v955_v7, %v3588_v14  ;;  %v1175_v32 = vrot.slane %v1087_v22, 2 }
 0x271   : > { %v1176_v45 = vrot.slane %v1088_v15, 2  ;;  %v1314_v38 = vmul.f32 %v3591_v19, %v4013_v0  ;;  %v2368_v60 = vmul.f32 %v4286_v8, %v2313_v2  ;;  %v2369_v10 = vmul.f32 %v4286_v8, %v2314_v50 }
 0x272   : > { %v2422_v37 = vadd.f32 %v4300_v40, %v2367_v21  ;;  %v957_v59 = vsel %vm916_vm2, %v955_v7, %v956_v28  ;;  %v1051_v48 = vadd.f32 %v956_v28, %v814_v4  ;;  %v1273_v6 = vadd.f32 %v1175_v32, %v1049_v61 }
 0x273   : > { %v1050_v46 = vadd.f32 %v957_v59, %v813_v58  ;;  %v1177_v33 = vsel %vm1124_vm3, %v1175_v32, %v1176_v45  ;;  %v1178_v34 = vsel %vm1124_vm3, %v1176_v45, %v3593_v20  ;;  %v4675_v29 = vpop.f32.mrb[0].mxu1  ;;  %v2423_v47 = vadd.f32 %v4300_v40, %v2368_v60 }
 0x274   : > { %v2424_v39 = vadd.f32 %v4300_v40, %v2369_v10  ;;  %v2543_v17 = vrot.slane %v2422_v37, 7  ;;  %v4679_v8 = vpop.f32.mrb[1].mxu1  ;;  %v1275_v63 = vadd.f32 %v1178_v34, %v1051_v48  ;;  %v1397_v58 = vmul.f32 %v3622_v36, %v3937_v35 }
 0x275   : > { %v1274_v3 = vadd.f32 %v1177_v33, %v1050_v46  ;;  %v1398_v4 = vmul.f32 %v3622_v36, %v4013_v0  ;;  %v4685_v62 = vpop.f32.mrb[2].mxu1  ;;  %v2544_v55 = vrot.slane %v2423_v47, 7  ;;  %v1358_v7 = vadd.f32 %v3610_v31, %v1273_v6 }
 0x276   : > { %v2546_v26 = vrot.slane %v2424_v39, 7  ;;  %v1610_v40 = vmul.f32 %v3601_v24, %v3937_v35  ;;  %v4690_v22 = vpop.f32.mrb[3].mxu1  ;;  %v1360_v2 = vadd.f32 %v1314_v38, %v1275_v63  ;;  %v1474_v50 = vrot.slane %v1397_v58, 1 }
 0x277   : > { %v1359_v15 = vadd.f32 %v1313_v25, %v1274_v3  ;;  %v1475_v21 = vrot.slane %v1398_v4, 1  ;;  %v2545_v28 = vsel %vm2482_vm4, %v2543_v17, %v2544_v55  ;;  %v1611_v32 = vmul.f32 %v3601_v24, %v4013_v0 }
 0x278   : > { %v2547_v61 = vsel %vm2482_vm4, %v2544_v55, %v2546_v26  ;;  %v1702_v45 = vrot.slane %v1610_v40, 2  ;;  %v1570_v37 = vadd.f32 %v1474_v50, %v1358_v7  ;;  %v1841_v25 = vmul.f32 %v3627_v42, %v4188_v56 }
 0x279   : > { %v2607_v60 = vpack.c.bf16 %v2547_v61, %v2545_v28  ;;  %v1476_v10 = vsel %vm916_vm2, %v1474_v50, %v1475_v21  ;;  %v1572_v59 = vadd.f32 %v1475_v21, %v1360_v2  ;;  %v1703_v48 = vrot.slane %v1611_v32, 2 }
 0x27a   : > { %v1571_v46 = vadd.f32 %v1476_v10, %v1359_v15  ;;  %v1842_v38 = vmul.f32 %v3627_v42, %v4281_v57  ;;  %v1801_v33 = vadd.f32 %v1702_v45, %v1570_v37  ;;  %v1923_v34 = vmul.f32 %v3629_v43, %v4188_v56 }
 0x27b   : > { %3328 = vmatprep.mubr.msk.bf16.mxu1 %vm458_vm1, %v2607_v60  ;;  %v1924_v47 = vmul.f32 %v3629_v43, %v4281_v57  ;;  %v2132_v39 = vmul.f32 %v4639_v13, %v4188_v56  ;;  %v1704_v17 = vsel %vm1124_vm3, %v1702_v45, %v1703_v48  ;;  %v1705_v6 = vsel %vm1124_vm3, %v1703_v48, %v3640_v49 }
 0x27c   : > { %v2133_v42 = vmul.f32 %v4639_v13, %v4281_v57  ;;  %v815_v3 = vmul.f32 %v3582_v11, %v3937_v35  ;;  %v1802_v63 = vadd.f32 %v1704_v17, %v1571_v46  ;;  %v1803_v58 = vadd.f32 %v1705_v6, %v1572_v59 }
 0x27d   : > { %v1884_v4 = vadd.f32 %v3646_v52, %v1801_v33  ;;  %v1998_v55 = vrot.slane %v1923_v34, 1  ;;  %v1999_v26 = vrot.slane %v1924_v47, 1  ;;  %v2220_v7 = vrot.slane %v2132_v39, 2  ;;  %v4735_v39 = vld [vmem:[%s5029_s5] ss:$0 sm:$0xff] }
 0x27e   : > { %v2221_v40 = vrot.slane %v2133_v42, 2  ;;  %v816_v15 = vmul.f32 %v3582_v11, %v4013_v0  ;;  %v1885_v2 = vadd.f32 %v1841_v25, %v1802_v63  ;;  %v1886_v50 = vadd.f32 %v1842_v38, %v1803_v58 }
 0x27f   : > { %v2092_v21 = vadd.f32 %v1998_v55, %v1884_v4  ;;  %v881_v28 = vmul.f32 %v3580_v9, %v3937_v35  ;;  %v2000_v61 = vsel %vm916_vm2, %v1998_v55, %v1999_v26  ;;  %v882_v60 = vmul.f32 %v3580_v9, %v4013_v0  ;;  %v4745_v55 = vld [vmem:[%s5030_s6] ss:$0 sm:$0xff] }
 0x280   : > { %v2222_v32 = vsel %vm1124_vm3, %v2220_v7, %v2221_v40  ;;  %v2223_v45 = vsel %vm1124_vm3, %v2221_v40, %v3648_v53  ;;  %v2093_v10 = vadd.f32 %v2000_v61, %v1885_v2  ;;  %v2094_v37 = vadd.f32 %v1999_v26, %v1886_v50 }
 0x281   : > { %v2315_v59 = vadd.f32 %v2220_v7, %v2092_v21  ;;  %v958_v46 = vrot.slane %v881_v28, 1  ;;  %v959_v48 = vrot.slane %v882_v60, 1  ;;  %v1089_v25 = vmul.f32 %v3584_v12, %v3937_v35 }
 0x282   : > { %v1090_v38 = vmul.f32 %v3584_v12, %v4013_v0  ;;  %v1315_v33 = vmul.f32 %v3591_v19, %v4188_v56  ;;  %v2316_v34 = vadd.f32 %v2222_v32, %v2093_v10  ;;  %v2317_v47 = vadd.f32 %v2223_v45, %v2094_v37 }
 0x283   : > { %v2370_v17 = vmul.f32 %v4735_v39, %v2315_v59  ;;  %v1052_v6 = vadd.f32 %v958_v46, %v3588_v14  ;;  %v960_v42 = vsel %vm916_vm2, %v958_v46, %v959_v48  ;;  %v1054_v35 = vadd.f32 %v959_v48, %v816_v15 }
 0x284   : > { %v1179_v63 = vrot.slane %v1089_v25, 2  ;;  %v1180_v58 = vrot.slane %v1090_v38, 2  ;;  %v2371_v0 = vmul.f32 %v4735_v39, %v2316_v34  ;;  %v2372_v4 = vmul.f32 %v4735_v39, %v2317_v47 }
 0x285   : > { %v2425_v26 = vadd.f32 %v4745_v55, %v2370_v17  ;;  %v1053_v7 = vadd.f32 %v960_v42, %v815_v3  ;;  %v1316_v50 = vmul.f32 %v3591_v19, %v4281_v57  ;;  %v1399_v3 = vmul.f32 %v3622_v36, %v4188_v56 }
 0x286   : > { %v1181_v40 = vsel %vm1124_vm3, %v1179_v63, %v1180_v58  ;;  %v1182_v2 = vsel %vm1124_vm3, %v1180_v58, %v3593_v20  ;;  %v1276_v15 = vadd.f32 %v1179_v63, %v1052_v6  ;;  %v2426_v21 = vadd.f32 %v4745_v55, %v2371_v0 }
 0x287   : > { %v2427_v28 = vadd.f32 %v4745_v55, %v2372_v4  ;;  %v2548_v61 = vrot.slane %v2425_v26, 7  ;;  %v1277_v32 = vadd.f32 %v1181_v40, %v1053_v7  ;;  %v1278_v45 = vadd.f32 %v1182_v2, %v1054_v35 }
 0x288   : > { %v1361_v60 = vadd.f32 %v3610_v31, %v1276_v15  ;;  %v1400_v10 = vmul.f32 %v3622_v36, %v4281_v57  ;;  %v2549_v37 = vrot.slane %v2426_v21, 7  ;;  %v1612_v19 = vmul.f32 %v3601_v24, %v4188_v56 }
 0x289   : > { %v2551_v59 = vrot.slane %v2427_v28, 7  ;;  %v1362_v46 = vadd.f32 %v1315_v33, %v1277_v32  ;;  %v1363_v48 = vadd.f32 %v1316_v50, %v1278_v45  ;;  %v1477_v25 = vrot.slane %v1399_v3, 1 }
 0x28a   : > { %v1478_v38 = vrot.slane %v1400_v10, 1  ;;  %v1613_v34 = vmul.f32 %v3601_v24, %v4281_v57  ;;  %v2550_v47 = vsel %vm2482_vm4, %v2548_v61, %v2549_v37  ;;  %v1706_v6 = vrot.slane %v1612_v19, 2 }
 0x28b   : > { %v2552_v17 = vsel %vm2482_vm4, %v2549_v37, %v2551_v59  ;;  %v2001_v42 = vrot.slane %v4111_v51, 1  ;;  %v1573_v33 = vadd.f32 %v1477_v25, %v1361_v60  ;;  %v2002_v4 = vrot.slane %v4209_v27, 1 }
 0x28c   : > { %v2608_v36 = vpack.c.bf16 %v2552_v17, %v2550_v47  ;;  %v1479_v35 = vsel %vm916_vm2, %v1477_v25, %v1478_v38  ;;  %v1575_v63 = vadd.f32 %v1478_v38, %v1363_v48  ;;  %v1707_v0 = vrot.slane %v1613_v34, 2 }
 0x28d   : > { %v1574_v58 = vadd.f32 %v1479_v35, %v1362_v46  ;;  %v2134_v26 = vmul.f32 %v4639_v13, %v4082_v5  ;;  %v1804_v24 = vadd.f32 %v1706_v6, %v1573_v33  ;;  %v5063_v7 = vrot.slane %v4215_v30, 2  ;;  %v4812_v33 = vld [vmem:[%s5032_s8] ss:$0 sm:$0xff] }
 0x28e   : > { %3329 = vmatmul.mubr.msk.bf16.gmra.mrb[24].mxu1 %vm458_vm1, %v2608_v36  ;;  %v817_v40 = vmul.f32 %v3582_v11, %v4188_v56  ;;  %v818_v2 = vmul.f32 %v3582_v11, %v4281_v57  ;;  %v1708_v15 = vsel %vm1124_vm3, %v1706_v6, %v1707_v0  ;;  %v1709_v27 = vsel %vm1124_vm3, %v1707_v0, %v3640_v49 }
 0x28f   : > { %v2227_v51 = vsel %vm1124_vm3, %v5063_v7, %v3648_v53  ;;  %v2003_v5 = vsel %vm916_vm2, %v2001_v42, %v2002_v4  ;;  %v2224_v13 = vrot.slane %v2134_v26, 2  ;;  %v1805_v50 = vadd.f32 %v1708_v15, %v1574_v58 }
 0x290   : > { %v1806_v21 = vadd.f32 %v1709_v27, %v1575_v63  ;;  %v1887_v28 = vadd.f32 %v3646_v52, %v1804_v24  ;;  %v883_v61 = vmul.f32 %v3580_v9, %v4188_v56  ;;  %v5064_v32 = vmov %v5063_v7 }
 0x291   : > { %v2226_v45 = vsel %vm1124_vm3, %v2224_v13, %v5064_v32  ;;  %v884_v11 = vmul.f32 %v3580_v9, %v4281_v57  ;;  %v1091_v60 = vmul.f32 %v3584_v12, %v4188_v56  ;;  %v1092_v3 = vmul.f32 %v3584_v12, %v4281_v57 }
 0x292   : > { %v1888_v10 = vadd.f32 %v4107_v41, %v1805_v50  ;;  %v1889_v37 = vadd.f32 %v4206_v54, %v1806_v21  ;;  %v2095_v59 = vadd.f32 %v2001_v42, %v1887_v28  ;;  %v961_v46 = vrot.slane %v883_v61, 1  ;;  %v5069_v21 = vld [vmem:[#allocation10_spill] sm:$0xff] }
 0x293   : > { %v962_v19 = vrot.slane %v884_v11, 1  ;;  %v1183_v48 = vrot.slane %v1091_v60, 2  ;;  %v1184_v30 = vrot.slane %v1092_v3, 2  ;;  %v5065_v25 = vrot.slane %v4201_v1, 2 }
 0x294   : > { %v5066_v38 = vrot.slane %v4101_v16, 2  ;;  %v2096_v34 = vadd.f32 %v2003_v5, %v1888_v10  ;;  %v2097_v56 = vadd.f32 %v2002_v4, %v1889_v37  ;;  %v2318_v47 = vadd.f32 %v2224_v13, %v2095_v59 }
 0x295   : > { %v1055_v12 = vadd.f32 %v961_v46, %v3588_v14  ;;  %v963_v41 = vsel %vm916_vm2, %v961_v46, %v962_v19  ;;  %v1057_v57 = vadd.f32 %v962_v19, %v818_v2  ;;  %v1185_v54 = vsel %vm1124_vm3, %v1183_v48, %v1184_v30 }
 0x296   : > { %v1712_v9 = vsel %vm1124_vm3, %v5066_v38, %v5065_v25  ;;  %v1186_v17 = vsel %vm1124_vm3, %v1184_v30, %v3593_v20  ;;  %v2319_v6 = vadd.f32 %v2226_v45, %v2096_v34  ;;  %v2320_v42 = vadd.f32 %v2227_v51, %v2097_v56  ;;  %v4825_v51 = vld [vmem:[%s5033_s9] ss:$0 sm:$0xff]  ;;  %v5071_v45 = vld [vmem:[#allocation11_spill] sm:$0xff] }
 0x297   : > { %v2373_v36 = vmul.f32 %v4735_v39, %v2318_v47  ;;  %v1056_v35 = vadd.f32 %v963_v41, %v817_v40  ;;  %v1279_v63 = vadd.f32 %v1183_v48, %v1055_v12  ;;  %v1281_v14 = vadd.f32 %v1186_v17, %v1057_v57 }
 0x298   : > { %v5067_v58 = vmov %v5065_v25  ;;  %v1927_v4 = vmul.f32 0.0, %v3629_v43  ;;  %v2374_v20 = vmul.f32 %v4735_v39, %v2319_v6  ;;  %v2375_v26 = vmul.f32 %v4735_v39, %v2320_v42 }
 0x299   : > { %v1713_v0 = vsel %vm1124_vm3, %v5067_v58, %v3640_v49  ;;  %v2428_v24 = vadd.f32 %v4745_v55, %v2373_v36  ;;  %v1280_v7 = vadd.f32 %v1185_v54, %v1056_v35  ;;  %v1364_v40 = vadd.f32 %v3610_v31, %v1279_v63 }
 0x29a   : > { %v1366_v1 = vadd.f32 %v4195_v18, %v1281_v14  ;;  %v2004_v2 = vrot.slane %v1927_v4, 1  ;;  %v2833_v43 = vmul.f32 %v4675_v29, %v4812_v33  ;;  %v2429_v49 = vadd.f32 %v4745_v55, %v2374_v20 }
 0x29b   : > { %v2430_v15 = vadd.f32 %v4745_v55, %v2375_v26  ;;  %v2553_v27 = vrot.slane %v2428_v24, 7  ;;  %v1365_v5 = vadd.f32 %v4093_v23, %v1280_v7  ;;  %v5068_v13 = vrot.slane %v4097_v44, 1 }
 0x29c   : > { %v5070_v28 = vrot.slane %v5069_v21, 1  ;;  %v2872_v31 = vadd.f32 %v4825_v51, %v2833_v43  ;;  %v2831_v18 = vmul.f32 %v4812_v33, %v4679_v8  ;;  %v2554_v32 = vrot.slane %v2429_v49, 7 }
 0x29d   : > { %v1576_v50 = vadd.f32 %v5068_v13, %v1364_v40  ;;  %v2556_v29 = vrot.slane %v2430_v15, 7  ;;  %v1577_v11 = vadd.f32 %v5071_v45, %v1365_v5  ;;  %v2834_v60 = vmul.f32 %v4685_v62, %v4812_v33  ;;  %v3310_v3 = vpop.f32.mrb[4].mxu1 }
 0x29e   : > { %v1578_v61 = vadd.f32 %v5070_v28, %v1366_v1  ;;  %v5072_v23 = vmov %v5066_v38  ;;  %v2904_v37 = vmax.f32 %v2872_v31, 0.0  ;;  %v2870_v59 = vadd.f32 %v4825_v51, %v2831_v18  ;;  %v2713_v46 = vpop.f32.mrb[5].mxu1 }
 0x29f   : > { %v1807_v44 = vadd.f32 %v5072_v23, %v1576_v50  ;;  %v2555_v19 = vsel %vm2482_vm4, %v2553_v27, %v2554_v32  ;;  %v2557_v8 = vsel %vm2482_vm4, %v2554_v32, %v2556_v29  ;;  %v1808_v48 = vadd.f32 %v1712_v9, %v1577_v11  ;;  %v3311_v25 = vpop.f32.mrb[6].mxu1 }
 0x2a0   : > { %v1809_v10 = vadd.f32 %v1713_v0, %v1578_v61  ;;  %v2873_v30 = vadd.f32 %v4825_v51, %v2834_v60  ;;  %v2609_v38 = vpack.c.bf16 %v2557_v8, %v2555_v19  ;;  %v2902_v16 = vmax.f32 %v2870_v59, 0.0  ;;  %3002 = vrot.lane.b32.xlu0 %v2904_v37, %s3365_s22  ;;  %v2716_v56 = vpop.f32.mrb[7].mxu1 }
 0x2a1   : > { %v1890_v62 = vadd.f32 %v3646_v52, %v1807_v44  ;;  %v1891_v47 = vadd.f32 %v3646_v52, %v1808_v48  ;;  %v2832_v41 = vmul.f32 %v4812_v33, %v4690_v22  ;;  %v2837_v9 = vmul.f32 %v3310_v3, %v4812_v33 }
 0x2a2   : > { %v1892_v34 = vadd.f32 %v3646_v52, %v1809_v10  ;;  %v2905_v12 = vmax.f32 %v2873_v30, 0.0  ;;  %3332 = vmatprep.mubr.msk.bf16.mxu1 %vm458_vm1, %v2609_v38  ;;  %v2835_v17 = vmul.f32 %v4812_v33, %v2713_v46  ;;  %v2838_v6 = vmul.f32 %v3311_v25, %v4812_v33 }
 0x2a3   : > { %v2098_v57 = vadd.f32 %v2004_v2, %v1890_v62  ;;  %v2099_v42 = vadd.f32 %v2004_v2, %v1891_v47  ;;  %v2871_v36 = vadd.f32 %v4825_v51, %v2832_v41  ;;  %v2876_v35 = vadd.f32 %v4825_v51, %v2837_v9 }
 0x2a4   : > { %v2100_v54 = vadd.f32 %v2004_v2, %v1892_v34  ;;  %3004 = vrot.lane.b32.xlu1 %v2905_v12, %s3365_s22  ;;  %v2877_v63 = vadd.f32 %v4825_v51, %v2838_v6  ;;  %2998 = vrot.lane.b32.xlu0 %v2902_v16, %s3365_s22  ;;  %v2836_v4 = vmul.f32 %v4812_v33, %v2716_v56 }
 0x2a5   : > { %v2321_v52 = vadd.f32 %v3648_v53, %v2098_v57  ;;  %v2322_v14 = vadd.f32 %v3648_v53, %v2099_v42  ;;  %v2903_v58 = vmax.f32 %v2871_v36, 0.0  ;;  %v2908_v0 = vmax.f32 %v2876_v35, 0.0 }
 0x2a6   : > { %v2323_v22 = vadd.f32 %v3648_v53, %v2100_v54  ;;  %v2874_v24 = vadd.f32 %v4825_v51, %v2835_v17  ;;  %v2909_v40 = vmax.f32 %v2877_v63, 0.0  ;;  %v2875_v43 = vadd.f32 %v4825_v51, %v2836_v4 }
 0x2a7   : > { %v2376_v20 = vmul.f32 %v4735_v39, %v2321_v52  ;;  %v2377_v7 = vmul.f32 %v4735_v39, %v2322_v14 }
 0x2a8   : > { %v2378_v26 = vmul.f32 %v4735_v39, %v2323_v22  ;;  %3000 = vrot.lane.b32.xlu1 %v2903_v58, %s3365_s22  ;;  %3010 = vrot.lane.b32.xlu0 %v2908_v0, %s3365_s22  ;;  %v2906_v15 = vmax.f32 %v2874_v24, 0.0  ;;  %v2907_v50 = vmax.f32 %v2875_v43, 0.0 }
 0x2a9   : > { %v2431_v1 = vadd.f32 %v4745_v55, %v2376_v20  ;;  %v2432_v53 = vadd.f32 %v4745_v55, %v2377_v7 }
 0x2aa   : > { %v2433_v2 = vadd.f32 %v4745_v55, %v2378_v26 }
 0x2ab   : > { %v2558_v27 = vrot.slane %v2431_v1, 7  ;;  %v2559_v5 = vrot.slane %v2432_v53, 7 }
 0x2ac   : > { %v2561_v49 = vrot.slane %v2433_v2, 7  ;;  %3012 = vrot.lane.b32.xlu1 %v2909_v40, %s3365_s22  ;;  %3006 = vrot.lane.b32.xlu0 %v2906_v15, %s3365_s22 }
 0x2ad   : > { %v2560_v39 = vsel %vm2482_vm4, %v2558_v27, %v2559_v5 }
 0x2ae   : > { %v2562_v13 = vsel %vm2482_vm4, %v2559_v5, %v2561_v49 }
 0x2af   : > { %v2610_v21 = vpack.c.bf16 %v2562_v13, %v2560_v39 }
 0x2b0   : > { %3008 = vrot.lane.b32.xlu1 %v2907_v50, %s3365_s22 }
 0x2b1   : > { %3333 = vmatmul.mubr.msk.bf16.gmra.mrb[28].mxu1 %vm458_vm1, %v2610_v21 }
 0x2c7   : > { %v3314_v55 = vpop.f32.mrb[8].mxu1 }
 0x2c8   : > { %v2841_v28 = vmul.f32 %v3314_v55, %v4812_v33  ;;  %v2729_v61 = vpop.f32.mrb[9].mxu1 }
 0x2c9   : > { %v2839_v31 = vmul.f32 %v4812_v33, %v2729_v61  ;;  %v3315_v18 = vpop.f32.mrb[10].mxu1 }
 0x2ca   : > { %v2880_v32 = vadd.f32 %v4825_v51, %v2841_v28  ;;  %v2842_v29 = vmul.f32 %v3315_v18, %v4812_v33  ;;  %v2732_v45 = vpop.f32.mrb[11].mxu1 }
 0x2cb   : > { %v2840_v11 = vmul.f32 %v4812_v33, %v2732_v45  ;;  %v2878_v3 = vadd.f32 %v4825_v51, %v2839_v31 }
 0x2cc   : > { %v2912_v60 = vmax.f32 %v2880_v32, 0.0  ;;  %v2881_v23 = vadd.f32 %v4825_v51, %v2842_v29 }
 0x2cd   : > { %v2879_v10 = vadd.f32 %v4825_v51, %v2840_v11  ;;  %v2910_v37 = vmax.f32 %v2878_v3, 0.0 }
 0x2ce   : > { %v2913_v44 = vmax.f32 %v2881_v23, 0.0  ;;  %3018 = vrot.lane.b32.xlu0 %v2912_v60, %s3365_s22 }
 0x2cf   : > { %v2911_v59 = vmax.f32 %v2879_v10, 0.0 }
 0x2d0   : > { %3020 = vrot.lane.b32.xlu1 %v2913_v44, %s3365_s22 }
 0x2d2   : > { %3014 = vrot.lane.b32.xlu0 %v2910_v37, %s3365_s22 }
 0x2d4   : > { %3016 = vrot.lane.b32.xlu1 %v2911_v59, %s3365_s22 }
 0x2f0   : > { %v3318_v46 = vpop.f32.mrb[12].mxu1 }
 0x2f1   : > { %v2845_v19 = vmul.f32 %v3318_v46, %v4812_v33  ;;  %v2745_v8 = vpop.f32.mrb[13].mxu1 }
 0x2f2   : > { %v2843_v48 = vmul.f32 %v4812_v33, %v2745_v8  ;;  %v3319_v30 = vpop.f32.mrb[14].mxu1 }
 0x2f3   : > { %v2884_v25 = vadd.f32 %v4825_v51, %v2845_v19  ;;  %v2846_v38 = vmul.f32 %v3319_v30, %v4812_v33  ;;  %v2748_v62 = vpop.f32.mrb[15].mxu1 }
 0x2f4   : > { %v2844_v34 = vmul.f32 %v4812_v33, %v2748_v62  ;;  %v2882_v56 = vadd.f32 %v4825_v51, %v2843_v48 }
 0x2f5   : > { %v2916_v16 = vmax.f32 %v2884_v25, 0.0  ;;  %v2885_v47 = vadd.f32 %v4825_v51, %v2846_v38 }
 0x2f6   : > { %v2883_v41 = vadd.f32 %v4825_v51, %v2844_v34  ;;  %v2914_v9 = vmax.f32 %v2882_v56, 0.0 }
 0x2f7   : > { %v2917_v12 = vmax.f32 %v2885_v47, 0.0  ;;  %3026 = vrot.lane.b32.xlu0 %v2916_v16, %s3365_s22 }
 0x2f8   : > { %v2915_v57 = vmax.f32 %v2883_v41, 0.0 }
 0x2f9   : > { %3028 = vrot.lane.b32.xlu1 %v2917_v12, %s3365_s22 }
 0x2fb   : > { %3022 = vrot.lane.b32.xlu0 %v2914_v9, %s3365_s22 }
 0x2fd   : > { %3024 = vrot.lane.b32.xlu1 %v2915_v57, %s3365_s22 }
 0x312   : > { %v3003_v54 = vpop.permute.xlu0 %3002 }
 0x313   : > { %3097 = vst.msk [vmem:[%s3442_s23 + $0x10] sm:$0xff] %vm3094_vm5, %v3003_v54 }
 0x316   : > { %v3005_v17 = vpop.permute.xlu1 %3004  ;;  %v2999_v6 = vpop.permute.xlu0 %2998 }
 0x317   : > { %3098 = vst.msk [vmem:[%s3442_s23 + $0x18] sm:$0xff] %vm3094_vm5, %v3005_v17  ;;  %v3322_v42 = vpop.f32.mrb[16].mxu1  ;;  %3095 = vst.msk [vmem:[%s3442_s23] sm:$0xff] %vm3094_vm5, %v2999_v6 }
 0x318   : > { %v2849_v36 = vmul.f32 %v3322_v42, %v4812_v33  ;;  %v2761_v35 = vpop.f32.mrb[17].mxu1 }
 0x319   : > { %v2847_v52 = vmul.f32 %v4812_v33, %v2761_v35  ;;  %v3323_v22 = vpop.f32.mrb[18].mxu1 }
 0x31a   : > { %v3001_v63 = vpop.permute.xlu1 %3000  ;;  %v2888_v14 = vadd.f32 %v4825_v51, %v2849_v36  ;;  %v2850_v58 = vmul.f32 %v3323_v22, %v4812_v33  ;;  %v2764_v0 = vpop.f32.mrb[19].mxu1 }
 0x31b   : > { %3096 = vst.msk [vmem:[%s3442_s23 + $0x8] sm:$0xff] %vm3094_vm5, %v3001_v63  ;;  %v3011_v4 = vpop.permute.xlu0 %3010  ;;  %v2848_v20 = vmul.f32 %v4812_v33, %v2764_v0  ;;  %v2886_v24 = vadd.f32 %v4825_v51, %v2847_v52 }
 0x31c   : > { %3101 = vst.msk [vmem:[%s3442_s23 + $0x30] sm:$0xff] %vm3094_vm5, %v3011_v4  ;;  %v2920_v26 = vmax.f32 %v2888_v14, 0.0  ;;  %v2889_v7 = vadd.f32 %v4825_v51, %v2850_v58 }
 0x31d   : > { %v2887_v2 = vadd.f32 %v4825_v51, %v2848_v20  ;;  %v2918_v43 = vmax.f32 %v2886_v24, 0.0 }
 0x31e   : > { %v3013_v40 = vpop.permute.xlu1 %3012  ;;  %v2921_v1 = vmax.f32 %v2889_v7, 0.0  ;;  %3034 = vrot.lane.b32.xlu0 %v2920_v26, %s3365_s22 }
 0x31f   : > { %3102 = vst.msk [vmem:[%s3442_s23 + $0x38] sm:$0xff] %vm3094_vm5, %v3013_v40  ;;  %v3007_v53 = vpop.permute.xlu0 %3006  ;;  %v2919_v15 = vmax.f32 %v2887_v2, 0.0 }
 0x320   : > { %3099 = vst.msk [vmem:[%s3442_s23 + $0x20] sm:$0xff] %vm3094_vm5, %v3007_v53  ;;  %3036 = vrot.lane.b32.xlu1 %v2921_v1, %s3365_s22 }
 0x322   : > { %v3009_v49 = vpop.permute.xlu1 %3008  ;;  %3030 = vrot.lane.b32.xlu0 %v2918_v43, %s3365_s22 }
 0x323   : > { %3100 = vst.msk [vmem:[%s3442_s23 + $0x28] sm:$0xff] %vm3094_vm5, %v3009_v49 }
 0x324   : > { %3032 = vrot.lane.b32.xlu1 %v2919_v15, %s3365_s22 }
 0x33b   : > { %v3326_v27 = vpop.f32.mrb[20].mxu1 }
 0x33c   : > { %v2853_v5 = vmul.f32 %v3326_v27, %v4812_v33  ;;  %v2777_v39 = vpop.f32.mrb[21].mxu1 }
 0x33d   : > { %v2851_v13 = vmul.f32 %v4812_v33, %v2777_v39  ;;  %v3327_v50 = vpop.f32.mrb[22].mxu1 }
 0x33e   : > { %v2892_v21 = vadd.f32 %v4825_v51, %v2853_v5  ;;  %v2854_v55 = vmul.f32 %v3327_v50, %v4812_v33  ;;  %v2780_v28 = vpop.f32.mrb[23].mxu1 }
 0x33f   : > { %v2852_v61 = vmul.f32 %v4812_v33, %v2780_v28  ;;  %v2890_v18 = vadd.f32 %v4825_v51, %v2851_v13 }
 0x340   : > { %v2924_v31 = vmax.f32 %v2892_v21, 0.0  ;;  %v2893_v32 = vadd.f32 %v4825_v51, %v2854_v55  ;;  %v3019_v29 = vpop.permute.xlu0 %3018 }
 0x341   : > { %3105 = vst.msk [vmem:[%s3442_s23 + $0x50] sm:$0xff] %vm3094_vm5, %v3019_v29  ;;  %v2891_v11 = vadd.f32 %v4825_v51, %v2852_v61  ;;  %v2922_v3 = vmax.f32 %v2890_v18, 0.0 }
 0x342   : > { %v2925_v45 = vmax.f32 %v2893_v32, 0.0  ;;  %3042 = vrot.lane.b32.xlu0 %v2924_v31, %s3365_s22  ;;  %v3021_v60 = vpop.permute.xlu1 %3020 }
 0x343   : > { %3106 = vst.msk [vmem:[%s3442_s23 + $0x58] sm:$0xff] %vm3094_vm5, %v3021_v60  ;;  %v2923_v44 = vmax.f32 %v2891_v11, 0.0 }
 0x344   : > { %3044 = vrot.lane.b32.xlu1 %v2925_v45, %s3365_s22  ;;  %v3015_v23 = vpop.permute.xlu0 %3014 }
 0x345   : > { %3103 = vst.msk [vmem:[%s3442_s23 + $0x40] sm:$0xff] %vm3094_vm5, %v3015_v23 }
 0x346   : > { %3038 = vrot.lane.b32.xlu0 %v2922_v3, %s3365_s22  ;;  %v3017_v10 = vpop.permute.xlu1 %3016 }
 0x347   : > { %3104 = vst.msk [vmem:[%s3442_s23 + $0x48] sm:$0xff] %vm3094_vm5, %v3017_v10 }
 0x348   : > { %3040 = vrot.lane.b32.xlu1 %v2923_v44, %s3365_s22 }
 0x361   : > { %v3330_v37 = vpop.f32.mrb[24].mxu1 }
 0x362   : > { %v2857_v59 = vmul.f32 %v3330_v37, %v4812_v33  ;;  %v2793_v46 = vpop.f32.mrb[25].mxu1 }
 0x363   : > { %v2855_v19 = vmul.f32 %v4812_v33, %v2793_v46  ;;  %v3331_v8 = vpop.f32.mrb[26].mxu1 }
 0x364   : > { %v2896_v48 = vadd.f32 %v4825_v51, %v2857_v59  ;;  %v2858_v30 = vmul.f32 %v3331_v8, %v4812_v33  ;;  %v2796_v25 = vpop.f32.mrb[27].mxu1 }
 0x365   : > { %v2856_v38 = vmul.f32 %v4812_v33, %v2796_v25  ;;  %v2894_v34 = vadd.f32 %v4825_v51, %v2855_v19 }
 0x366   : > { %v2928_v62 = vmax.f32 %v2896_v48, 0.0  ;;  %v2897_v16 = vadd.f32 %v4825_v51, %v2858_v30 }
 0x367   : > { %v2895_v47 = vadd.f32 %v4825_v51, %v2856_v38  ;;  %v2926_v41 = vmax.f32 %v2894_v34, 0.0 }
 0x368   : > { %v2929_v56 = vmax.f32 %v2897_v16, 0.0  ;;  %3050 = vrot.lane.b32.xlu0 %v2928_v62, %s3365_s22 }
 0x369   : > { %v3027_v12 = vpop.permute.xlu0 %3026  ;;  %v2927_v57 = vmax.f32 %v2895_v47, 0.0 }
 0x36a   : > { %3052 = vrot.lane.b32.xlu1 %v2929_v56, %s3365_s22  ;;  %3109 = vst.msk [vmem:[%s3442_s23 + $0x70] sm:$0xff] %vm3094_vm5, %v3027_v12 }
 0x36b   : > { %v3029_v9 = vpop.permute.xlu1 %3028 }
 0x36c   : > { %3046 = vrot.lane.b32.xlu0 %v2926_v41, %s3365_s22  ;;  %3110 = vst.msk [vmem:[%s3442_s23 + $0x78] sm:$0xff] %vm3094_vm5, %v3029_v9 }
 0x36d   : > { %v3023_v54 = vpop.permute.xlu0 %3022 }
 0x36e   : > { %3048 = vrot.lane.b32.xlu1 %v2927_v57, %s3365_s22  ;;  %3107 = vst.msk [vmem:[%s3442_s23 + $0x60] sm:$0xff] %vm3094_vm5, %v3023_v54 }
 0x36f   : > { %v3025_v17 = vpop.permute.xlu1 %3024 }
 0x370   : > { %3108 = vst.msk [vmem:[%s3442_s23 + $0x68] sm:$0xff] %vm3094_vm5, %v3025_v17 }
 0x384   : > { %v3334_v6 = vpop.f32.mrb[28].mxu1 }
 0x385   : > { %v2809_v42 = vpop.f32.mrb[29].mxu1  ;;  %v2861_v36 = vmul.f32 %v3334_v6, %v4812_v33 }
 0x386   : > { %v2859_v35 = vmul.f32 %v4812_v33, %v2809_v42  ;;  %v3335_v52 = vpop.f32.mrb[30].mxu1 }
 0x387   : > { %v2812_v22 = vpop.f32.mrb[31].mxu1  ;;  %v2862_v14 = vmul.f32 %v3335_v52, %v4812_v33  ;;  %v2900_v0 = vadd.f32 %v4825_v51, %v2861_v36 }
 0x388   : > { %v2898_v63 = vadd.f32 %v4825_v51, %v2859_v35  ;;  %v2860_v58 = vmul.f32 %v4812_v33, %v2812_v22 }
 0x389   : > { %v2901_v26 = vadd.f32 %v4825_v51, %v2862_v14  ;;  %v2932_v7 = vmax.f32 %v2900_v0, 0.0 }
 0x38a   : > { %v2930_v4 = vmax.f32 %v2898_v63, 0.0  ;;  %v2899_v20 = vadd.f32 %v4825_v51, %v2860_v58 }
 0x38b   : > { %v2933_v40 = vmax.f32 %v2901_v26, 0.0 }
 0x38c   : > { %v2931_v24 = vmax.f32 %v2899_v20, 0.0  ;;  %3054 = vrot.lane.b32.xlu0 %v2930_v4, %s3365_s22 }
 0x38e   : > { %3056 = vrot.lane.b32.xlu1 %v2931_v24, %s3365_s22 }
 0x390   : > { %3058 = vrot.lane.b32.xlu0 %v2932_v7, %s3365_s22  ;;  %v3035_v33 = vpop.permute.xlu0 %3034 }
 0x391   : > { %3113 = vst.msk [vmem:[%s3442_s23 + $0x90] sm:$0xff] %vm3094_vm5, %v3035_v33 }
 0x392   : > { %3060 = vrot.lane.b32.xlu1 %v2933_v40, %s3365_s22  ;;  %v3037_v51 = vpop.permute.xlu1 %3036 }
 0x393   : > { %3114 = vst.msk [vmem:[%s3442_s23 + $0x98] sm:$0xff] %vm3094_vm5, %v3037_v51 }
 0x394   : > { %v3031_v1 = vpop.permute.xlu0 %3030 }
 0x395   : > { %3111 = vst.msk [vmem:[%s3442_s23 + $0x80] sm:$0xff] %vm3094_vm5, %v3031_v1 }
 0x396   : > { %v3033_v2 = vpop.permute.xlu1 %3032 }
 0x397   : > { %3112 = vst.msk [vmem:[%s3442_s23 + $0x88] sm:$0xff] %vm3094_vm5, %v3033_v2 }
 0x3b4   : > { %v3043_v53 = vpop.permute.xlu0 %3042 }
 0x3b5   : > { %3117 = vst.msk [vmem:[%s3442_s23 + $0xb0] sm:$0xff] %vm3094_vm5, %v3043_v53 }
 0x3b6   : > { %v3045_v43 = vpop.permute.xlu1 %3044 }
 0x3b7   : > { %3118 = vst.msk [vmem:[%s3442_s23 + $0xb8] sm:$0xff] %vm3094_vm5, %v3045_v43 }
 0x3b8   : > { %v3039_v49 = vpop.permute.xlu0 %3038 }
 0x3b9   : > { %3115 = vst.msk [vmem:[%s3442_s23 + $0xa0] sm:$0xff] %vm3094_vm5, %v3039_v49 }
 0x3ba   : > { %v3041_v15 = vpop.permute.xlu1 %3040 }
 0x3bb   : > { %3116 = vst.msk [vmem:[%s3442_s23 + $0xa8] sm:$0xff] %vm3094_vm5, %v3041_v15 }
 0x3da   : > { %v3051_v27 = vpop.permute.xlu0 %3050 }
 0x3db   : > { %3121 = vst.msk [vmem:[%s3442_s23 + $0xd0] sm:$0xff] %vm3094_vm5, %v3051_v27 }
 0x3dc   : > { %v3053_v5 = vpop.permute.xlu1 %3052 }
 0x3dd   : > { %3122 = vst.msk [vmem:[%s3442_s23 + $0xd8] sm:$0xff] %vm3094_vm5, %v3053_v5 }
 0x3de   : > { %v3047_v39 = vpop.permute.xlu0 %3046 }
 0x3df   : > { %3119 = vst.msk [vmem:[%s3442_s23 + $0xc0] sm:$0xff] %vm3094_vm5, %v3047_v39 }
 0x3e0   : > { %v3049_v13 = vpop.permute.xlu1 %3048 }
 0x3e1   : > { %3120 = vst.msk [vmem:[%s3442_s23 + $0xc8] sm:$0xff] %vm3094_vm5, %v3049_v13 }
 0x3fe   : > { %v3055_v50 = vpop.permute.xlu0 %3054 }
 0x3ff   : > { %3123 = vst.msk [vmem:[%s3442_s23 + $0xe0] sm:$0xff] %vm3094_vm5, %v3055_v50 }
 0x400   : > { %v3057_v21 = vpop.permute.xlu1 %3056 }
 0x401   : > { %3124 = vst.msk [vmem:[%s3442_s23 + $0xe8] sm:$0xff] %vm3094_vm5, %v3057_v21 }
 0x402   : > { %v3059_v55 = vpop.permute.xlu0 %3058 }
 0x403   : > { %3125 = vst.msk [vmem:[%s3442_s23 + $0xf0] sm:$0xff] %vm3094_vm5, %v3059_v55 }
 0x404   : > { %v3061_v28 = vpop.permute.xlu1 %3060 }
 0x405   : > { %3126 = vst.msk [vmem:[%s3442_s23 + $0xf8] sm:$0xff] %vm3094_vm5, %v3061_v28 }
 0x406 PF: > { %s20_s13 = sadd.s32 1, %s3362_s13  }
 0x407   : > { %p17_p4 = scmp.ge.s32.totalorder %s20_s13, 4  }
 0x409   :  { %19 = sbr.rel (!%p17_p4) target bundleno = 1 (0x1), region = 90 }

</bundles_post_ra>
